<compile_context>
chip_gen: v7x
topology: tpu7x:2x2x1
jax: 0.10.0
libtpu: 0.0.40
codegen_flags: <defaults>
</compile_context>

<pallas_src>
import numpy as np
import jax
import jax.numpy as jnp
from jax import lax
from jax.experimental import pallas as pl
from jax.experimental.pallas import tpu as pltpu

# ---------------- model dims (synthetic backbone = single 3x3 conv, padding=1) ----------------
B = 2           # batch
C_IN = 4        # input channels
H = W = 16      # spatial
C_OUT = 8       # backbone output channels
POOL = 7        # AdaptiveAvgPool2d output size
EMB = C_OUT * POOL * POOL   # 392 = embedding_size fed to emb_linear_regression
HID = 256
N_CLASSES = 6
NEG_SLOPE = 0.05

IN_FLAT = C_IN * H * W      # 1024
B_PAD = 8                   # full f32 sublane tile for the batch dim
N_PAD = 128                 # lane-dense padded class dim (6 -> 128)


# ---------------------------------- fused Pallas kernel ----------------------------------
def fused_forward_kernel(x_ref, m_ref, bp_ref, w1_ref, b1_ref, w2_ref, b2_ref, o_ref):
    """Whole forward pass resident in VMEM / vregs.

    x:  (8, 1024)   f32   flattened NCHW input (zero-padded batch rows)
    m:  (1024, 392) bf16  conv(3x3,pad=1) + AdaptiveAvgPool2d(7,7) + Flatten folded operator
    bp: (1, 392)    f32   conv bias propagated through the avg-pool
    w1: (392, 256)  bf16  emb_linear_regression weight;  b1: (1, 256) f32
    w2: (256, 128)  bf16  regression_head weight (zero cols 6..127); b2: (1,128) f32, -1e30 pads
    o:  (8, 128)    f32   softmax probabilities (padded classes are exactly 0)
    """
    xb = x_ref[...].astype(jnp.bfloat16)
    # backbone conv + adaptive avg-pool + flatten, as one bf16 MXU matmul with f32 accumulation
    pooled = jnp.dot(xb, m_ref[...], preferred_element_type=jnp.float32) + bp_ref[...]
    a = jnp.where(pooled >= 0, pooled, NEG_SLOPE * pooled)          # LeakyReLU(0.05), f32
    h1 = jnp.dot(a.astype(jnp.bfloat16), w1_ref[...],
                 preferred_element_type=jnp.float32) + b1_ref[...]
    a1 = jnp.where(h1 >= 0, h1, NEG_SLOPE * h1)                     # LeakyReLU(0.05), f32
    logits = jnp.dot(a1.astype(jnp.bfloat16), w2_ref[...],
                     preferred_element_type=jnp.float32) + b2_ref[...]
    # softmax over dim=1; padded classes carry a -1e30 bias, so exp underflows to exactly 0
    # (relies on real logits being finite / >> -1e30, which holds for any sane parameter scale).
    mx = jnp.max(logits, axis=-1, keepdims=True)
    e = jnp.exp(logits - mx)
    s = jnp.sum(e, axis=-1, keepdims=True)
    r = pl.reciprocal(s, approx=True)        # EUP slot
    r = r * (2.0 - s * r)                    # one Newton-Raphson step -> ~f32-exact 1/s
    o_ref[...] = e * r


_VMEM = pl.BlockSpec(memory_space=pltpu.MemorySpace.VMEM)

_COST = pl.CostEstimate(
    flops=2 * B_PAD * (IN_FLAT * EMB + EMB * HID + HID * N_PAD),
    transcendentals=B_PAD * N_PAD + B_PAD,
    bytes_accessed=(B_PAD * IN_FLAT * 4            # x (f32)
                    + IN_FLAT * EMB * 2            # m (bf16)
                    + EMB * 4                      # bp
                    + EMB * HID * 2                # w1 (bf16)
                    + HID * 4                      # b1
                    + HID * N_PAD * 2              # w2 (bf16)
                    + N_PAD * 4                    # b2
                    + B_PAD * N_PAD * 4),          # out
)


@jax.jit
def regression_model_forward(x, params):
    """x: (B, C_IN, H, W) float32 NCHW. Returns (B, 6) softmax probabilities."""
    b = x.shape[0]
    x_flat = x.reshape(b, -1)                                   # NCHW flatten (contiguous, free)
    x_pad = jnp.zeros((B_PAD, IN_FLAT), jnp.float32).at[:b].set(x_flat)
    out_pad = pl.pallas_call(
        fused_forward_kernel,
        out_shape=jax.ShapeDtypeStruct((B_PAD, N_PAD), jnp.float32),
        in_specs=[_VMEM] * 7,
        out_specs=_VMEM,
        cost_estimate=_COST,
    )(x_pad, params["m"], params["bp"], params["w1"], params["b1"],
      params["w2"], params["b2"])
    return out_pad[:b, :N_CLASSES]


# ------------------------------ parameter prep (host, done once) ------------------------------
def adaptive_pool_matrix(in_size: int, out_size: int) -> np.ndarray:
    """Row i averages input indices [floor(i*in/out), ceil((i+1)*in/out)) — PyTorch semantics."""
    P = np.zeros((out_size, in_size), np.float32)
    for i in range(out_size):
        s = (i * in_size) // out_size
        e = -((-(i + 1) * in_size) // out_size)  # ceil
        P[i, s:e] = 1.0 / (e - s)
    return P


def build_params(wc_oihw, bc, w1, b1, w2, b2):
    """Fold conv(3x3, pad=1) + AdaptiveAvgPool2d((7,7)) + Flatten into one linear operator.
    Weight matrices are stored in bf16 (biases stay f32); only the class dim is padded (6->128,
    zero weight columns + -1e30 bias so padded probabilities are exactly 0)."""
    ph = adaptive_pool_matrix(H, POOL)   # (7, H)
    pw = adaptive_pool_matrix(W, POOL)   # (7, W)

    # shifted pool matrices folding in the 3 conv taps per axis (zero 'same' padding):
    #   ph_s[a, p, h] = ph[p, h-(a-1)] if in range else 0
    ph_s = np.zeros((3, POOL, H), np.float32)
    pw_s = np.zeros((3, POOL, W), np.float32)
    for k in range(3):
        for h in range(H):
            src = h - (k - 1)
            if 0 <= src < H:
                ph_s[k, :, h] = ph[:, src]
        for w in range(W):
            src = w - (k - 1)
            if 0 <= src < W:
                pw_s[k, :, w] = pw[:, src]

    wc_np = np.asarray(wc_oihw, np.float32)        # (C_OUT, C_IN, 3, 3)
    # M[c,h,w,o,p,q] = sum_{a,b} wc[o,c,a,b] * ph_s[a,p,h] * pw_s[b,q,w]
    m = np.einsum("ocab,aph,bqw->chwopq", wc_np, ph_s, pw_s)
    m = m.reshape(IN_FLAT, EMB).astype(np.float32)                   # (1024, 392)
    bias_flat = np.repeat(np.asarray(bc, np.float32), POOL * POOL)   # (392,)

    w2_pad = np.zeros((HID, N_PAD), np.float32)
    w2_pad[:, :N_CLASSES] = np.asarray(w2, np.float32)
    b2_pad = np.full((1, N_PAD), -1e30, np.float32)
    b2_pad[0, :N_CLASSES] = np.asarray(b2, np.float32)

    return {
        "m": jnp.asarray(m, dtype=jnp.bfloat16),
        "bp": jnp.asarray(bias_flat.reshape(1, EMB), dtype=jnp.float32),
        "w1": jnp.asarray(np.asarray(w1, np.float32), dtype=jnp.bfloat16),
        "b1": jnp.asarray(b1, dtype=jnp.float32).reshape(1, HID),
        "w2": jnp.asarray(w2_pad, dtype=jnp.bfloat16),
        "b2": jnp.asarray(b2_pad, dtype=jnp.float32),
    }


# ----------------------------------- references -----------------------------------
def reference_forward_folded(x, params):
    """Same math the kernel does (bf16 weights / bf16 matmul inputs, f32 accumulation) in plain
    JAX — validates the kernel itself independent of bf16 weight-quantization error."""
    bf = lambda t: t.astype(jnp.bfloat16)
    leaky = lambda t: jnp.where(t >= 0, t, NEG_SLOPE * t)
    xf = x.reshape(x.shape[0], -1)
    pooled = jnp.dot(bf(xf), params["m"], preferred_element_type=jnp.float32) + params["bp"]
    a = leaky(pooled)
    h1 = jnp.dot(bf(a), params["w1"], preferred_element_type=jnp.float32) + params["b1"]
    a1 = leaky(h1)
    logits = jnp.dot(bf(a1), params["w2"], preferred_element_type=jnp.float32) + params["b2"]
    return jax.nn.softmax(logits, axis=1)[:, :N_CLASSES]


def reference_forward_f32(x, wc_oihw, bc, w1, b1, w2, b2):
    """Full-precision, unfused reference matching the original module's forward."""
    ph = jnp.asarray(adaptive_pool_matrix(H, POOL))
    pw = jnp.asarray(adaptive_pool_matrix(W, POOL))
    conv = lax.conv_general_dilated(
        x, wc_oihw, window_strides=(1, 1), padding="SAME",
        dimension_numbers=("NCHW", "OIHW", "NCHW"),
        precision=lax.Precision.HIGHEST,
    ) + bc.reshape(1, C_OUT, 1, 1)
    pooled = jnp.einsum("ih,bchw,jw->bcij", ph, conv, pw, precision=lax.Precision.HIGHEST)
    flat = pooled.reshape(x.shape[0], -1)
    leaky = lambda t: jnp.where(t >= 0, t, NEG_SLOPE * t)
    a = leaky(flat)
    h1 = jnp.dot(a, w1, precision=lax.Precision.HIGHEST) + b1
    a1 = leaky(h1)
    logits = jnp.dot(a1, w2, precision=lax.Precision.HIGHEST) + b2
    return jax.nn.softmax(logits, axis=1)


# ---------------------------------------- main ----------------------------------------
if __name__ == "__main__":
    key = jax.random.PRNGKey(0)
    k_x, k_wc, k_bc, k_w1, k_b1, k_w2, k_b2 = jax.random.split(key, 7)

    x = jax.random.normal(k_x, (B, C_IN, H, W), dtype=jnp.float32)

    # deterministic parameter init (shapes from the module __init__)
    wc_oihw = jax.random.normal(k_wc, (C_OUT, C_IN, 3, 3), jnp.float32) * 0.1   # backbone conv
    bc = jax.random.normal(k_bc, (C_OUT,), jnp.float32) * 0.1
    w1 = jax.random.normal(k_w1, (EMB, HID), jnp.float32) * 0.05    # emb_linear_regression
    b1 = jax.random.normal(k_b1, (HID,), jnp.float32) * 0.05
    w2 = jax.random.normal(k_w2, (HID, N_CLASSES), jnp.float32) * 0.05   # regression_head
    b2 = jax.random.normal(k_b2, (N_CLASSES,), jnp.float32) * 0.05

    params = build_params(wc_oihw, bc, w1, b1, w2, b2)

    out = regression_model_forward(x, params)
    out = jax.block_until_ready(out)
    assert out.shape == (B, N_CLASSES)

    # 1) tight check against a plain-JAX run of the exact same (bf16-weight) math
    ref_q = reference_forward_folded(x, params)
    np.testing.assert_allclose(np.asarray(out), np.asarray(ref_q), atol=5e-4, rtol=5e-4)

    # 2) looser check against the full-precision f32 module semantics (bf16 weight quantization)
    ref_f32 = reference_forward_f32(x, wc_oihw, bc, w1, b1, w2, b2)
    np.testing.assert_allclose(np.asarray(out), np.asarray(ref_f32), atol=3e-3, rtol=5e-2)

    # 3) softmax rows sum to 1 (padded classes contribute exactly 0)
    np.testing.assert_allclose(np.asarray(out).sum(axis=1), np.ones(B), atol=1e-4)

    print("KERNEL_OK")
</pallas_src>

<mosaic_0001>
module attributes {stable_mosaic.version = 11 : i64} {
  func.func @fused_forward_kernel(%arg0: memref<8x1024xf32, #tpu.memory_space<vmem>>, %arg1: memref<1024x392xbf16, #tpu.memory_space<vmem>>, %arg2: memref<1x392xf32, #tpu.memory_space<vmem>>, %arg3: memref<392x256xbf16, #tpu.memory_space<vmem>>, %arg4: memref<1x256xf32, #tpu.memory_space<vmem>>, %arg5: memref<256x128xbf16, #tpu.memory_space<vmem>>, %arg6: memref<1x128xf32, #tpu.memory_space<vmem>>, %arg7: memref<8x128xf32, #tpu.memory_space<vmem>>) attributes {dimension_semantics = [], scalar_prefetch = 0 : i64, scratch_operands = 0 : i64, tpu.core_type = #tpu.core_type<tc>} {
    %c0 = arith.constant 0 : index
    %c0_0 = arith.constant 0 : index
    %0 = vector.load %arg0[%c0, %c0_0] : memref<8x1024xf32, #tpu.memory_space<vmem>>, vector<8x1024xf32>
    %1 = arith.truncf %0 : vector<8x1024xf32> to vector<8x1024xbf16>
    %c0_1 = arith.constant 0 : index
    %c0_2 = arith.constant 0 : index
    %2 = vector.load %arg1[%c0_1, %c0_2] : memref<1024x392xbf16, #tpu.memory_space<vmem>>, vector<1024x392xbf16>
    %cst = arith.constant dense<0.000000e+00> : vector<8x392xf32>
    %3 = tpu.matmul %1, %2, %cst {dimension_numbers = #tpu.dot_dimension_numbers<[1], [0], [0], [1], [0, 0, 1, 1], [], []>} : vector<8x1024xbf16>, vector<1024x392xbf16>, vector<8x392xf32> -> vector<8x392xf32>
    %c0_3 = arith.constant 0 : index
    %c0_4 = arith.constant 0 : index
    %4 = vector.load %arg2[%c0_3, %c0_4] : memref<1x392xf32, #tpu.memory_space<vmem>>, vector<1x392xf32>
    %5 = vector.broadcast %4 : vector<1x392xf32> to vector<8x392xf32>
    %6 = arith.addf %3, %5 : vector<8x392xf32>
    %cst_5 = arith.constant 0.000000e+00 : f32
    %7 = vector.broadcast %cst_5 : f32 to vector<8x392xf32>
    %8 = arith.cmpf oge, %6, %7 : vector<8x392xf32>
    %cst_6 = arith.constant 5.000000e-02 : f32
    %9 = vector.broadcast %cst_6 : f32 to vector<8x392xf32>
    %10 = arith.mulf %9, %6 : vector<8x392xf32>
    %11 = arith.select %8, %6, %10 : vector<8x392xi1>, vector<8x392xf32>
    %12 = arith.truncf %11 : vector<8x392xf32> to vector<8x392xbf16>
    %c0_7 = arith.constant 0 : index
    %c0_8 = arith.constant 0 : index
    %13 = vector.load %arg3[%c0_7, %c0_8] : memref<392x256xbf16, #tpu.memory_space<vmem>>, vector<392x256xbf16>
    %cst_9 = arith.constant dense<0.000000e+00> : vector<8x256xf32>
    %14 = tpu.matmul %12, %13, %cst_9 {dimension_numbers = #tpu.dot_dimension_numbers<[1], [0], [0], [1], [0, 0, 1, 1], [], []>} : vector<8x392xbf16>, vector<392x256xbf16>, vector<8x256xf32> -> vector<8x256xf32>
    %c0_10 = arith.constant 0 : index
    %c0_11 = arith.constant 0 : index
    %15 = vector.load %arg4[%c0_10, %c0_11] : memref<1x256xf32, #tpu.memory_space<vmem>>, vector<1x256xf32>
    %16 = vector.broadcast %15 : vector<1x256xf32> to vector<8x256xf32>
    %17 = arith.addf %14, %16 : vector<8x256xf32>
    %cst_12 = arith.constant 0.000000e+00 : f32
    %18 = vector.broadcast %cst_12 : f32 to vector<8x256xf32>
    %19 = arith.cmpf oge, %17, %18 : vector<8x256xf32>
    %cst_13 = arith.constant 5.000000e-02 : f32
    %20 = vector.broadcast %cst_13 : f32 to vector<8x256xf32>
    %21 = arith.mulf %20, %17 : vector<8x256xf32>
    %22 = arith.select %19, %17, %21 : vector<8x256xi1>, vector<8x256xf32>
    %23 = arith.truncf %22 : vector<8x256xf32> to vector<8x256xbf16>
    %c0_14 = arith.constant 0 : index
    %c0_15 = arith.constant 0 : index
    %24 = vector.load %arg5[%c0_14, %c0_15] : memref<256x128xbf16, #tpu.memory_space<vmem>>, vector<256x128xbf16>
    %cst_16 = arith.constant dense<0.000000e+00> : vector<8x128xf32>
    %25 = tpu.matmul %23, %24, %cst_16 {dimension_numbers = #tpu.dot_dimension_numbers<[1], [0], [0], [1], [0, 0, 1, 1], [], []>} : vector<8x256xbf16>, vector<256x128xbf16>, vector<8x128xf32> -> vector<8x128xf32>
    %c0_17 = arith.constant 0 : index
    %c0_18 = arith.constant 0 : index
    %26 = vector.load %arg6[%c0_17, %c0_18] : memref<1x128xf32, #tpu.memory_space<vmem>>, vector<1x128xf32>
    %27 = vector.broadcast %26 : vector<1x128xf32> to vector<8x128xf32>
    %28 = arith.addf %25, %27 : vector<8x128xf32>
    %cst_19 = arith.constant dense<0xFF800000> : vector<8xf32>
    %29 = vector.multi_reduction <maximumf>, %28, %cst_19 [1] : vector<8x128xf32> to vector<8xf32>
    %30 = vector.shape_cast %29 : vector<8xf32> to vector<8x1xf32>
    %31 = vector.broadcast %30 : vector<8x1xf32> to vector<8x128xf32>
    %32 = arith.subf %28, %31 : vector<8x128xf32>
    %33 = math.exp %32 : vector<8x128xf32>
    %cst_20 = arith.constant dense<0.000000e+00> : vector<8xf32>
    %34 = vector.multi_reduction <add>, %33, %cst_20 [1] : vector<8x128xf32> to vector<8xf32>
    %35 = vector.shape_cast %34 : vector<8xf32> to vector<8x1xf32>
    %36 = tpu.reciprocal %35 {approx = true} : vector<8x1xf32> -> vector<8x1xf32>
    %37 = arith.mulf %35, %36 : vector<8x1xf32>
    %cst_21 = arith.constant 2.000000e+00 : f32
    %38 = vector.broadcast %cst_21 : f32 to vector<8x1xf32>
    %39 = arith.subf %38, %37 : vector<8x1xf32>
    %40 = arith.mulf %36, %39 : vector<8x1xf32>
    %41 = vector.broadcast %40 : vector<8x1xf32> to vector<8x128xf32>
    %42 = arith.mulf %33, %41 : vector<8x128xf32>
    %c0_22 = arith.constant 0 : index
    %c0_23 = arith.constant 0 : index
    %43 = vector.load %arg7[%c0_22, %c0_23] : memref<8x128xf32, #tpu.memory_space<vmem>>, vector<8x128xf32>
    tpu.vector_store %arg7[%c0_22, %c0_23], %42 {strides = array<i32>} : memref<8x128xf32, #tpu.memory_space<vmem>>, vector<8x128xf32>,
    return
  }
}

</mosaic_0001>

<bundles_post_ra>
// kernel: regression_model_forward.1
= control target key start
LH: loop header
LB: loop body
LE: loop exit
PB: predicated region body
PF: predicated region fallthrough
CT: control target
= control target key end

     0   :  { %vm2255_vm0 = vcmask 1043456   ;;  %vm2251_vm5 = vcmask 64512   ;;  %s4454_s1 = inlined_call_operand.vmem [shape: bf16[1024,392], index: 1, kind: input, shape index: {}]   ;;  %s4455_s0 = inlined_call_operand.vmem [shape: f32[8,1024], index: 0, kind: input, shape index: {}]   ;;  %s4456_s3 = inlined_call_operand.vmem [shape: bf16[392,256], index: 3, kind: input, shape index: {}]   ;;  %s4457_s5 = inlined_call_operand.vmem [shape: bf16[256,128], index: 5, kind: input, shape index: {}]   ;;  %s4458_s2 = inlined_call_operand.vmem [shape: f32[1,392], index: 2, kind: input, shape index: {}]   ;;  %s4459_s4 = inlined_call_operand.vmem [shape: f32[1,256], index: 4, kind: input, shape index: {}]   ;;  %s4460_s6 = inlined_call_operand.vmem [shape: f32[1,128], index: 6, kind: input, shape index: {}]   ;;  %s4461_s7 = inlined_call_operand.vmem [shape: f32[8,128], index: 7, kind: output, shape index: {}]  }
   0x1   :  { %v2923_v0 = vld [vmem:[%s4454_s1 + $0x4] ss:$16 sps:$4 sm:$0xff]   ;;  %v2925_v1 = vld [vmem:[%s4454_s1 + $0xc] ss:$16 sps:$4 sm:$0xff]   ;;  %v2927_v2 = vld [vmem:[%s4454_s1] ss:$16 sps:$4 sm:$0xff]  }
   0x2   :  { %1601 = vmatprep.subr.bf16.mxu0 %v2923_v0  ;;  %v2928_v3 = vld [vmem:[%s4454_s1 + $0x8] ss:$16 sps:$4 sm:$0xff]   ;;  %1765 = vmatprep.subr.bf16.mxu1 %v2925_v1  ;;  %v2929_v4 = vld [vmem:[%s4454_s1 + $0x24] ss:$16 sps:$4 sm:$0xff]   ;;  %v2931_v5 = vld [vmem:[%s4454_s1 + $0x2c] ss:$16 sps:$4 sm:$0xff]  }
   0x3   :  { %1602 = vmatpush1.bf16.msra.mxu0 %v2927_v2  ;;  %1766 = vmatpush1.bf16.msra.mxu1 %v2928_v3  ;;  %v2933_v6 = vld [vmem:[%s4454_s1 + $0x20] ss:$16 sps:$4 sm:$0xff]   ;;  %v2934_v7 = vld [vmem:[%s4454_s1 + $0x28] ss:$16 sps:$4 sm:$0xff]   ;;  %v2935_v8 = vld [vmem:[%s4454_s1 + $0x44] ss:$16 sps:$4 sm:$0xff]  }
   0x4   :  { %1603 = vmatprep.subr.bf16.mxu0 %v2929_v4  ;;  %1767 = vmatprep.subr.bf16.mxu1 %v2931_v5  ;;  %v2937_v9 = vld [vmem:[%s4454_s1 + $0x4c] ss:$16 sps:$4 sm:$0xff]   ;;  %v2939_v10 = vld [vmem:[%s4454_s1 + $0x40] ss:$16 sps:$4 sm:$0xff]   ;;  %v2940_v11 = vld [vmem:[%s4454_s1 + $0x48] ss:$16 sps:$4 sm:$0xff]  }
   0x5   :  { %v2941_v12 = vld [vmem:[%s4454_s1 + $0x64] ss:$16 sps:$4 sm:$0xff]   ;;  %v2943_v13 = vld [vmem:[%s4454_s1 + $0x6c] ss:$16 sps:$4 sm:$0xff]   ;;  %v2945_v14 = vld [vmem:[%s4454_s1 + $0x60] ss:$16 sps:$4 sm:$0xff]  }
   0x6   :  { %v2946_v15 = vld [vmem:[%s4454_s1 + $0x68] ss:$16 sps:$4 sm:$0xff]   ;;  %v2947_v16 = vld [vmem:[%s4454_s1 + $0x84] ss:$16 sps:$4 sm:$0xff]   ;;  %v2949_v17 = vld [vmem:[%s4454_s1 + $0x8c] ss:$16 sps:$4 sm:$0xff]  }
   0x7   :  { %1604 = vmatpush1.bf16.msra.mxu0 %v2933_v6  ;;  %1768 = vmatpush1.bf16.msra.mxu1 %v2934_v7  ;;  %v2951_v18 = vld [vmem:[%s4454_s1 + $0x80] ss:$16 sps:$4 sm:$0xff]   ;;  %v2952_v19 = vld [vmem:[%s4454_s1 + $0x88] ss:$16 sps:$4 sm:$0xff]   ;;  %v2953_v20 = vld [vmem:[%s4454_s1 + $0xa4] ss:$16 sps:$4 sm:$0xff]  }
   0x8   :  { %1605 = vmatprep.subr.bf16.mxu0 %v2935_v8  ;;  %1769 = vmatprep.subr.bf16.mxu1 %v2937_v9  ;;  %v2955_v21 = vld [vmem:[%s4454_s1 + $0xac] ss:$16 sps:$4 sm:$0xff]   ;;  %v2957_v22 = vld [vmem:[%s4454_s1 + $0xa0] ss:$16 sps:$4 sm:$0xff]   ;;  %v2958_v23 = vld [vmem:[%s4454_s1 + $0xa8] ss:$16 sps:$4 sm:$0xff]  }
   0x9   :  { %v2959_v24 = vld [vmem:[%s4454_s1 + $0xc4] ss:$16 sps:$4 sm:$0xff]   ;;  %v2961_v25 = vld [vmem:[%s4454_s1 + $0xcc] ss:$16 sps:$4 sm:$0xff]   ;;  %v2963_v26 = vld [vmem:[%s4454_s1 + $0xc0] ss:$16 sps:$4 sm:$0xff]  }
   0xa   :  { %v2964_v27 = vld [vmem:[%s4454_s1 + $0xc8] ss:$16 sps:$4 sm:$0xff]   ;;  %v2965_v28 = vld [vmem:[%s4454_s1 + $0xe4] ss:$16 sps:$4 sm:$0xff]   ;;  %v2967_v29 = vld [vmem:[%s4454_s1 + $0xec] ss:$16 sps:$4 sm:$0xff]  }
   0xb   :  { %1606 = vmatpush1.bf16.msra.mxu0 %v2939_v10  ;;  %1770 = vmatpush1.bf16.msra.mxu1 %v2940_v11  ;;  %v2969_v30 = vld [vmem:[%s4454_s1 + $0xe0] ss:$16 sps:$4 sm:$0xff]   ;;  %v2970_v31 = vld [vmem:[%s4454_s1 + $0xe8] ss:$16 sps:$4 sm:$0xff]   ;;  %v2971_v32 = vld [vmem:[%s4454_s1 + $0x104] ss:$16 sps:$4 sm:$0xff]  }
   0xc   :  { %1607 = vmatprep.subr.bf16.mxu0 %v2941_v12  ;;  %1771 = vmatprep.subr.bf16.mxu1 %v2943_v13  ;;  %v2973_v33 = vld [vmem:[%s4454_s1 + $0x10c] ss:$16 sps:$4 sm:$0xff]   ;;  %v2975_v34 = vld [vmem:[%s4454_s1 + $0x100] ss:$16 sps:$4 sm:$0xff]   ;;  %v2976_v35 = vld [vmem:[%s4454_s1 + $0x108] ss:$16 sps:$4 sm:$0xff]  }
   0xd   :  { %v2977_v36 = vld [vmem:[%s4454_s1 + $0x124] ss:$16 sps:$4 sm:$0xff]   ;;  %v2979_v37 = vld [vmem:[%s4454_s1 + $0x12c] ss:$16 sps:$4 sm:$0xff]   ;;  %v2981_v38 = vld [vmem:[%s4454_s1 + $0x120] ss:$16 sps:$4 sm:$0xff]  }
   0xe   :  { %v2982_v39 = vld [vmem:[%s4454_s1 + $0x128] ss:$16 sps:$4 sm:$0xff]   ;;  %v2983_v40 = vld [vmem:[%s4454_s1 + $0x144] ss:$16 sps:$4 sm:$0xff]   ;;  %v2985_v41 = vld [vmem:[%s4454_s1 + $0x14c] ss:$16 sps:$4 sm:$0xff]  }
   0xf   :  { %1608 = vmatpush1.bf16.msra.mxu0 %v2945_v14  ;;  %1772 = vmatpush1.bf16.msra.mxu1 %v2946_v15  ;;  %v2987_v42 = vld [vmem:[%s4454_s1 + $0x140] ss:$16 sps:$4 sm:$0xff]   ;;  %v2988_v43 = vld [vmem:[%s4454_s1 + $0x148] ss:$16 sps:$4 sm:$0xff]   ;;  %v2989_v44 = vld [vmem:[%s4454_s1 + $0x164] ss:$16 sps:$4 sm:$0xff]  }
  0x10   :  { %1609 = vmatprep.subr.bf16.mxu0 %v2947_v16  ;;  %1773 = vmatprep.subr.bf16.mxu1 %v2949_v17  ;;  %v2991_v45 = vld [vmem:[%s4454_s1 + $0x16c] ss:$16 sps:$4 sm:$0xff]   ;;  %v2993_v47 = vld [vmem:[%s4454_s1 + $0x160] ss:$16 sps:$4 sm:$0xff]   ;;  %v2994_v49 = vld [vmem:[%s4454_s1 + $0x168] ss:$16 sps:$4 sm:$0xff]  }
  0x11   :  { %v28_v46 = vld [vmem:[%s4455_s0 + $0x8] sm:$0xff]  ;;  %v2995_v50 = vld [vmem:[%s4454_s1 + $0x184] ss:$16 sps:$4 sm:$0xff]   ;;  %v2999_v52 = vld [vmem:[%s4454_s1 + $0x180] ss:$16 sps:$4 sm:$0xff]  }
  0x12   :  { %v36_v48 = vpack.c.bf16 %v28_v46, %v28_v46  ;;  %v2997_v51 = vld [vmem:[%s4454_s1 + $0x18c] ss:$16 sps:$4 sm:$0xff]   ;;  %v3000_v53 = vld [vmem:[%s4454_s1 + $0x188] ss:$16 sps:$4 sm:$0xff]   ;;  %v3001_v54 = vld [vmem:[%s4454_s1 + $0x1a4] ss:$16 sps:$4 sm:$0xff]  }
  0x13   :  { %1610 = vmatpush1.bf16.msra.mxu0 %v2951_v18  ;;  %1774 = vmatpush1.bf16.msra.mxu1 %v2952_v19  ;;  %v3003_v55 = vld [vmem:[%s4454_s1 + $0x1ac] ss:$16 sps:$4 sm:$0xff]   ;;  %v3005_v56 = vld [vmem:[%s4454_s1 + $0x1a0] ss:$16 sps:$4 sm:$0xff]   ;;  %v3006_v57 = vld [vmem:[%s4454_s1 + $0x1a8] ss:$16 sps:$4 sm:$0xff]  }
  0x14   :  { %1611 = vmatprep.subr.bf16.mxu0 %v2953_v20  ;;  %1775 = vmatprep.subr.bf16.mxu1 %v2955_v21  ;;  %v3007_v58 = vld [vmem:[%s4454_s1 + $0x1c4] ss:$16 sps:$4 sm:$0xff]   ;;  %v3009_v59 = vld [vmem:[%s4454_s1 + $0x1cc] ss:$16 sps:$4 sm:$0xff]   ;;  %v3011_v60 = vld [vmem:[%s4454_s1 + $0x1c0] ss:$16 sps:$4 sm:$0xff]  }
  0x15   :  { %1633 = vmatprep.mubr.bf16.mxu0 %v36_v48  ;;  %1797 = vmatprep.mubr.bf16.mxu1 %v36_v48  ;;  %v3012_v61 = vld [vmem:[%s4454_s1 + $0x1c8] ss:$16 sps:$4 sm:$0xff]   ;;  %v3013_v62 = vld [vmem:[%s4454_s1 + $0x1e4] ss:$16 sps:$4 sm:$0xff]   ;;  %v3015_v63 = vld [vmem:[%s4454_s1 + $0x1ec] ss:$16 sps:$4 sm:$0xff]  }
  0x16   :  { %v3017_v0 = vld [vmem:[%s4454_s1 + $0x1e0] ss:$16 sps:$4 sm:$0xff]   ;;  %v3018_v1 = vld [vmem:[%s4454_s1 + $0x1e8] ss:$16 sps:$4 sm:$0xff]   ;;  %v3021_v3 = vld [vmem:[%s4454_s1 + $0x204] ss:$16 sps:$4 sm:$0xff]  }
  0x17   :  { %1612 = vmatpush1.bf16.msra.mxu0 %v2957_v22  ;;  %1776 = vmatpush1.bf16.msra.mxu1 %v2958_v23  ;;  %v27_v2 = vld [vmem:[%s4455_s0] sm:$0xff]  ;;  %v3024_v4 = vld [vmem:[%s4454_s1 + $0x20c] ss:$16 sps:$4 sm:$0xff]   ;;  %v3022_v7 = vld [vmem:[%s4454_s1 + $0x208] ss:$16 sps:$4 sm:$0xff]  }
  0x18   :  { %1613 = vmatprep.subr.bf16.mxu0 %v2959_v24  ;;  %1777 = vmatprep.subr.bf16.mxu1 %v2961_v25  ;;  %v35_v5 = vpack.c.bf16 %v27_v2, %v27_v2  ;;  %v3019_v6 = vld [vmem:[%s4454_s1 + $0x200] ss:$16 sps:$4 sm:$0xff]   ;;  %v3027_v8 = vld [vmem:[%s4454_s1 + $0x224] ss:$16 sps:$4 sm:$0xff]   ;;  %v3030_v9 = vld [vmem:[%s4454_s1 + $0x22c] ss:$16 sps:$4 sm:$0xff]  }
  0x19   :  { %v3025_v10 = vld [vmem:[%s4454_s1 + $0x220] ss:$16 sps:$4 sm:$0xff]   ;;  %v3028_v11 = vld [vmem:[%s4454_s1 + $0x228] ss:$16 sps:$4 sm:$0xff]   ;;  %v3033_v12 = vld [vmem:[%s4454_s1 + $0x244] ss:$16 sps:$4 sm:$0xff]  }
  0x1a   :  { %v3036_v13 = vld [vmem:[%s4454_s1 + $0x24c] ss:$16 sps:$4 sm:$0xff]   ;;  %v3031_v14 = vld [vmem:[%s4454_s1 + $0x240] ss:$16 sps:$4 sm:$0xff]   ;;  %v3034_v15 = vld [vmem:[%s4454_s1 + $0x248] ss:$16 sps:$4 sm:$0xff]  }
  0x1b   :  { %1614 = vmatpush1.bf16.msra.mxu0 %v2963_v26  ;;  %1778 = vmatpush1.bf16.msra.mxu1 %v2964_v27  ;;  %v3039_v16 = vld [vmem:[%s4454_s1 + $0x264] ss:$16 sps:$4 sm:$0xff]   ;;  %v3042_v17 = vld [vmem:[%s4454_s1 + $0x26c] ss:$16 sps:$4 sm:$0xff]   ;;  %v3037_v18 = vld [vmem:[%s4454_s1 + $0x260] ss:$16 sps:$4 sm:$0xff]  }
  0x1c   :  { %1615 = vmatprep.subr.bf16.mxu0 %v2965_v28  ;;  %1779 = vmatprep.subr.bf16.mxu1 %v2967_v29  ;;  %v3040_v19 = vld [vmem:[%s4454_s1 + $0x268] ss:$16 sps:$4 sm:$0xff]   ;;  %v3045_v20 = vld [vmem:[%s4454_s1 + $0x284] ss:$16 sps:$4 sm:$0xff]   ;;  %v3048_v21 = vld [vmem:[%s4454_s1 + $0x28c] ss:$16 sps:$4 sm:$0xff]  }
  0x1d   :  { %v3043_v22 = vld [vmem:[%s4454_s1 + $0x280] ss:$16 sps:$4 sm:$0xff]   ;;  %v3046_v23 = vld [vmem:[%s4454_s1 + $0x288] ss:$16 sps:$4 sm:$0xff]   ;;  %v3051_v24 = vld [vmem:[%s4454_s1 + $0x2a4] ss:$16 sps:$4 sm:$0xff]  }
  0x1e   :  { %v3054_v25 = vld [vmem:[%s4454_s1 + $0x2ac] ss:$16 sps:$4 sm:$0xff]   ;;  %v3049_v26 = vld [vmem:[%s4454_s1 + $0x2a0] ss:$16 sps:$4 sm:$0xff]   ;;  %v3052_v27 = vld [vmem:[%s4454_s1 + $0x2a8] ss:$16 sps:$4 sm:$0xff]  }
  0x1f   :  { %1616 = vmatpush1.bf16.msra.mxu0 %v2969_v30  ;;  %1780 = vmatpush1.bf16.msra.mxu1 %v2970_v31  ;;  %v3057_v28 = vld [vmem:[%s4454_s1 + $0x2c4] ss:$16 sps:$4 sm:$0xff]   ;;  %v3060_v29 = vld [vmem:[%s4454_s1 + $0x2cc] ss:$16 sps:$4 sm:$0xff]   ;;  %v3055_v31 = vld [vmem:[%s4454_s1 + $0x2c0] ss:$16 sps:$4 sm:$0xff]  }
  0x20   :  { %1617 = vmatprep.subr.bf16.mxu0 %v2971_v32  ;;  %1781 = vmatprep.subr.bf16.mxu1 %v2973_v33  ;;  %v30_v30 = vld [vmem:[%s4455_s0 + $0x18] sm:$0xff]  ;;  %v3081_v46 = vld [vmem:[%s4454_s1 + $0x344] ss:$16 sps:$4 sm:$0xff]   ;;  %v3079_v48 = vld [vmem:[%s4454_s1 + $0x340] ss:$16 sps:$4 sm:$0xff]  }
  0x21   :  { %v38_v32 = vpack.c.bf16 %v30_v30, %v30_v30  ;;  %v3058_v33 = vld [vmem:[%s4454_s1 + $0x2c8] ss:$16 sps:$4 sm:$0xff]   ;;  %v3111_v2 = vld [vmem:[%s4454_s1 + $0x3e4] ss:$16 sps:$4 sm:$0xff]  }
  0x22   :  { %v3147_v30 = vld [vmem:[%s4454_s1 + $0x4a4] ss:$16 sps:$4 sm:$0xff]  }
  0x23   :  { %1618 = vmatpush1.bf16.msra.mxu0 %v2975_v34  ;;  %1782 = vmatpush1.bf16.msra.mxu1 %v2976_v35  ;;  %v3063_v34 = vld [vmem:[%s4454_s1 + $0x2e4] ss:$16 sps:$4 sm:$0xff]   ;;  %v3066_v35 = vld [vmem:[%s4454_s1 + $0x2ec] ss:$16 sps:$4 sm:$0xff]  }
  0x24   :  { %1619 = vmatprep.subr.bf16.mxu0 %v2977_v36  ;;  %1783 = vmatprep.subr.bf16.mxu1 %v2979_v37  ;;  %v3061_v36 = vld [vmem:[%s4454_s1 + $0x2e0] ss:$16 sps:$4 sm:$0xff]   ;;  %v3064_v37 = vld [vmem:[%s4454_s1 + $0x2e8] ss:$16 sps:$4 sm:$0xff]  }
  0x27   :  { %1620 = vmatpush1.bf16.msra.mxu0 %v2981_v38  ;;  %1784 = vmatpush1.bf16.msra.mxu1 %v2982_v39  ;;  %v3069_v38 = vld [vmem:[%s4454_s1 + $0x304] ss:$16 sps:$4 sm:$0xff]   ;;  %v3072_v39 = vld [vmem:[%s4454_s1 + $0x30c] ss:$16 sps:$4 sm:$0xff]  }
  0x28   :  { %1621 = vmatprep.subr.bf16.mxu0 %v2983_v40  ;;  %1785 = vmatprep.subr.bf16.mxu1 %v2985_v41  ;;  %v3067_v40 = vld [vmem:[%s4454_s1 + $0x300] ss:$16 sps:$4 sm:$0xff]   ;;  %v3070_v41 = vld [vmem:[%s4454_s1 + $0x308] ss:$16 sps:$4 sm:$0xff]  }
  0x2b   :  { %1622 = vmatpush1.bf16.msra.mxu0 %v2987_v42  ;;  %1786 = vmatpush1.bf16.msra.mxu1 %v2988_v43  ;;  %v3075_v42 = vld [vmem:[%s4454_s1 + $0x324] ss:$16 sps:$4 sm:$0xff]   ;;  %v3078_v43 = vld [vmem:[%s4454_s1 + $0x32c] ss:$16 sps:$4 sm:$0xff]  }
  0x2c   :  { %1623 = vmatprep.subr.bf16.mxu0 %v2989_v44  ;;  %1787 = vmatprep.subr.bf16.mxu1 %v2991_v45  ;;  %v3073_v44 = vld [vmem:[%s4454_s1 + $0x320] ss:$16 sps:$4 sm:$0xff]   ;;  %v3076_v45 = vld [vmem:[%s4454_s1 + $0x328] ss:$16 sps:$4 sm:$0xff]  }
  0x2f   :  { %1624 = vmatpush1.bf16.msra.mxu0 %v2993_v47  ;;  %1788 = vmatpush1.bf16.msra.mxu1 %v2994_v49  ;;  %v3084_v47 = vld [vmem:[%s4454_s1 + $0x34c] ss:$16 sps:$4 sm:$0xff]   ;;  %v3082_v49 = vld [vmem:[%s4454_s1 + $0x348] ss:$16 sps:$4 sm:$0xff]  }
  0x30   :  { %1625 = vmatprep.subr.bf16.mxu0 %v2995_v50  ;;  %1789 = vmatprep.subr.bf16.mxu1 %v2997_v51  ;;  %v3087_v50 = vld [vmem:[%s4454_s1 + $0x364] ss:$16 sps:$4 sm:$0xff]   ;;  %v3090_v51 = vld [vmem:[%s4454_s1 + $0x36c] ss:$16 sps:$4 sm:$0xff]  }
  0x33   :  { %1626 = vmatpush1.bf16.msra.mxu0 %v2999_v52  ;;  %1790 = vmatpush1.bf16.msra.mxu1 %v3000_v53  ;;  %v3085_v52 = vld [vmem:[%s4454_s1 + $0x360] ss:$16 sps:$4 sm:$0xff]   ;;  %v3088_v53 = vld [vmem:[%s4454_s1 + $0x368] ss:$16 sps:$4 sm:$0xff]  }
  0x34   :  { %1627 = vmatprep.subr.bf16.mxu0 %v3001_v54  ;;  %1791 = vmatprep.subr.bf16.mxu1 %v3003_v55  ;;  %v3093_v54 = vld [vmem:[%s4454_s1 + $0x384] ss:$16 sps:$4 sm:$0xff]   ;;  %v3096_v55 = vld [vmem:[%s4454_s1 + $0x38c] ss:$16 sps:$4 sm:$0xff]  }
  0x37   :  { %1628 = vmatpush1.bf16.msra.mxu0 %v3005_v56  ;;  %1792 = vmatpush1.bf16.msra.mxu1 %v3006_v57  ;;  %v3091_v56 = vld [vmem:[%s4454_s1 + $0x380] ss:$16 sps:$4 sm:$0xff]   ;;  %v3094_v57 = vld [vmem:[%s4454_s1 + $0x388] ss:$16 sps:$4 sm:$0xff]  }
  0x38   :  { %1629 = vmatprep.subr.bf16.mxu0 %v3007_v58  ;;  %1793 = vmatprep.subr.bf16.mxu1 %v3009_v59  ;;  %v3099_v58 = vld [vmem:[%s4454_s1 + $0x3a4] ss:$16 sps:$4 sm:$0xff]   ;;  %v3102_v59 = vld [vmem:[%s4454_s1 + $0x3ac] ss:$16 sps:$4 sm:$0xff]  }
  0x3b   :  { %1630 = vmatpush1.bf16.msra.mxu0 %v3011_v60  ;;  %1794 = vmatpush1.bf16.msra.mxu1 %v3012_v61  ;;  %v3097_v60 = vld [vmem:[%s4454_s1 + $0x3a0] ss:$16 sps:$4 sm:$0xff]   ;;  %v3100_v61 = vld [vmem:[%s4454_s1 + $0x3a8] ss:$16 sps:$4 sm:$0xff]  }
  0x3c   :  { %1631 = vmatprep.subr.bf16.mxu0 %v3013_v62  ;;  %1795 = vmatprep.subr.bf16.mxu1 %v3015_v63  ;;  %v3105_v62 = vld [vmem:[%s4454_s1 + $0x3c4] ss:$16 sps:$4 sm:$0xff]   ;;  %v3108_v63 = vld [vmem:[%s4454_s1 + $0x3cc] ss:$16 sps:$4 sm:$0xff]  }
  0x3f   :  { %1632 = vmatpush1.bf16.msra.mxu0 %v3017_v0  ;;  %1796 = vmatpush1.bf16.msra.mxu1 %v3018_v1  ;;  %v3103_v0 = vld [vmem:[%s4454_s1 + $0x3c0] ss:$16 sps:$4 sm:$0xff]   ;;  %v3106_v1 = vld [vmem:[%s4454_s1 + $0x3c8] ss:$16 sps:$4 sm:$0xff]  }
  0x40   :  { %1642 = vmatprep.subr.bf16.mxu0 %v3021_v3  ;;  %1806 = vmatprep.subr.bf16.mxu1 %v3024_v4  ;;  %v3114_v3 = vld [vmem:[%s4454_s1 + $0x3ec] ss:$16 sps:$4 sm:$0xff]   ;;  %v3109_v4 = vld [vmem:[%s4454_s1 + $0x3e0] ss:$16 sps:$4 sm:$0xff]  }
  0x42   :  { %1634 = vmatmul.mubr.bf16.vlgmr.msra.gmra.mrb[0].mxu0 %v35_v5  ;;  %1798 = vmatmul.mubr.bf16.vlgmr.msra.gmra.mrb[0].mxu1 %v35_v5  ;;  %v3112_v5 = vld [vmem:[%s4454_s1 + $0x3e8] ss:$16 sps:$4 sm:$0xff]  }
  0x43   :  { %1643 = vmatpush1.bf16.msra.mxu0 %v3019_v6  ;;  %1807 = vmatpush1.bf16.msra.mxu1 %v3022_v7  ;;  %v3117_v6 = vld [vmem:[%s4454_s1 + $0x404] ss:$16 sps:$4 sm:$0xff]  }
  0x44   :  { %1644 = vmatprep.subr.bf16.mxu0 %v3027_v8  ;;  %1808 = vmatprep.subr.bf16.mxu1 %v3030_v9  ;;  %v29_v7 = vld [vmem:[%s4455_s0 + $0x10] sm:$0xff]  ;;  %v3120_v8 = vld [vmem:[%s4454_s1 + $0x40c] ss:$16 sps:$4 sm:$0xff]  }
  0x45   :  { %1674 = vmatprep.mubr.bf16.mxu0 %v38_v32  ;;  %1838 = vmatprep.mubr.bf16.mxu1 %v38_v32  ;;  %v3115_v9 = vld [vmem:[%s4454_s1 + $0x400] ss:$16 sps:$4 sm:$0xff]  }
  0x46   :  { %v3145_v32 = vld [vmem:[%s4454_s1 + $0x4a0] ss:$16 sps:$4 sm:$0xff]  }
  0x47   :  { %1645 = vmatpush1.bf16.msra.mxu0 %v3025_v10  ;;  %1809 = vmatpush1.bf16.msra.mxu1 %v3028_v11  ;;  %v3118_v10 = vld [vmem:[%s4454_s1 + $0x408] ss:$16 sps:$4 sm:$0xff]   ;;  %v37_v11 = vpack.c.bf16 %v29_v7, %v29_v7  ;;  %v3210_v7 = vld [vmem:[%s4454_s1 + $0x5ec] ss:$16 sps:$4 sm:$0xff]  }
  0x48   :  { %1646 = vmatprep.subr.bf16.mxu0 %v3033_v12  ;;  %1810 = vmatprep.subr.bf16.mxu1 %v3036_v13  ;;  %v3123_v12 = vld [vmem:[%s4454_s1 + $0x424] ss:$16 sps:$4 sm:$0xff]   ;;  %v3126_v13 = vld [vmem:[%s4454_s1 + $0x42c] ss:$16 sps:$4 sm:$0xff]  }
  0x4b   :  { %1647 = vmatpush1.bf16.msra.mxu0 %v3031_v14  ;;  %1811 = vmatpush1.bf16.msra.mxu1 %v3034_v15  ;;  %v32_v14 = vld [vmem:[%s4455_s0 + $0x28] sm:$0xff] }
  0x4c   :  { %1648 = vmatprep.subr.bf16.mxu0 %v3039_v16  ;;  %1812 = vmatprep.subr.bf16.mxu1 %v3042_v17  ;;  %v40_v15 = vpack.c.bf16 %v32_v14, %v32_v14  ;;  %v3121_v16 = vld [vmem:[%s4454_s1 + $0x420] ss:$16 sps:$4 sm:$0xff]   ;;  %v3124_v17 = vld [vmem:[%s4454_s1 + $0x428] ss:$16 sps:$4 sm:$0xff]  }
  0x4d   :  { %v3214_v14 = vld [vmem:[%s4454_s1 + $0x608] ss:$16 sps:$4 sm:$0xff]  }
  0x4f   :  { %1649 = vmatpush1.bf16.msra.mxu0 %v3037_v18  ;;  %1813 = vmatpush1.bf16.msra.mxu1 %v3040_v19  ;;  %v3129_v18 = vld [vmem:[%s4454_s1 + $0x444] ss:$16 sps:$4 sm:$0xff]   ;;  %v3132_v19 = vld [vmem:[%s4454_s1 + $0x44c] ss:$16 sps:$4 sm:$0xff]  }
  0x50   :  { %1650 = vmatprep.subr.bf16.mxu0 %v3045_v20  ;;  %1814 = vmatprep.subr.bf16.mxu1 %v3048_v21  ;;  %v3127_v20 = vld [vmem:[%s4454_s1 + $0x440] ss:$16 sps:$4 sm:$0xff]   ;;  %v3130_v21 = vld [vmem:[%s4454_s1 + $0x448] ss:$16 sps:$4 sm:$0xff]  }
  0x53   :  { %1651 = vmatpush1.bf16.msra.mxu0 %v3043_v22  ;;  %1815 = vmatpush1.bf16.msra.mxu1 %v3046_v23  ;;  %v3135_v22 = vld [vmem:[%s4454_s1 + $0x464] ss:$16 sps:$4 sm:$0xff]   ;;  %v3138_v23 = vld [vmem:[%s4454_s1 + $0x46c] ss:$16 sps:$4 sm:$0xff]  }
  0x54   :  { %1652 = vmatprep.subr.bf16.mxu0 %v3051_v24  ;;  %1816 = vmatprep.subr.bf16.mxu1 %v3054_v25  ;;  %v3133_v24 = vld [vmem:[%s4454_s1 + $0x460] ss:$16 sps:$4 sm:$0xff]   ;;  %v3136_v25 = vld [vmem:[%s4454_s1 + $0x468] ss:$16 sps:$4 sm:$0xff]  }
  0x57   :  { %1653 = vmatpush1.bf16.msra.mxu0 %v3049_v26  ;;  %1817 = vmatpush1.bf16.msra.mxu1 %v3052_v27  ;;  %v3141_v26 = vld [vmem:[%s4454_s1 + $0x484] ss:$16 sps:$4 sm:$0xff]   ;;  %v3144_v27 = vld [vmem:[%s4454_s1 + $0x48c] ss:$16 sps:$4 sm:$0xff]  }
  0x58   :  { %1654 = vmatprep.subr.bf16.mxu0 %v3057_v28  ;;  %1818 = vmatprep.subr.bf16.mxu1 %v3060_v29  ;;  %v3139_v28 = vld [vmem:[%s4454_s1 + $0x480] ss:$16 sps:$4 sm:$0xff]   ;;  %v3142_v29 = vld [vmem:[%s4454_s1 + $0x488] ss:$16 sps:$4 sm:$0xff]  }
  0x5b   :  { %1655 = vmatpush1.bf16.msra.mxu0 %v3055_v31  ;;  %1819 = vmatpush1.bf16.msra.mxu1 %v3058_v33  ;;  %v3150_v31 = vld [vmem:[%s4454_s1 + $0x4ac] ss:$16 sps:$4 sm:$0xff]   ;;  %v3148_v33 = vld [vmem:[%s4454_s1 + $0x4a8] ss:$16 sps:$4 sm:$0xff]  }
  0x5c   :  { %1656 = vmatprep.subr.bf16.mxu0 %v3063_v34  ;;  %1820 = vmatprep.subr.bf16.mxu1 %v3066_v35  ;;  %v3153_v34 = vld [vmem:[%s4454_s1 + $0x4c4] ss:$16 sps:$4 sm:$0xff]   ;;  %v3156_v35 = vld [vmem:[%s4454_s1 + $0x4cc] ss:$16 sps:$4 sm:$0xff]  }
  0x5f   :  { %1657 = vmatpush1.bf16.msra.mxu0 %v3061_v36  ;;  %1821 = vmatpush1.bf16.msra.mxu1 %v3064_v37  ;;  %v3151_v36 = vld [vmem:[%s4454_s1 + $0x4c0] ss:$16 sps:$4 sm:$0xff]   ;;  %v3154_v37 = vld [vmem:[%s4454_s1 + $0x4c8] ss:$16 sps:$4 sm:$0xff]  }
  0x60   :  { %1658 = vmatprep.subr.bf16.mxu0 %v3069_v38  ;;  %1822 = vmatprep.subr.bf16.mxu1 %v3072_v39  ;;  %v3159_v38 = vld [vmem:[%s4454_s1 + $0x4e4] ss:$16 sps:$4 sm:$0xff]   ;;  %v3162_v39 = vld [vmem:[%s4454_s1 + $0x4ec] ss:$16 sps:$4 sm:$0xff]  }
  0x63   :  { %1659 = vmatpush1.bf16.msra.mxu0 %v3067_v40  ;;  %1823 = vmatpush1.bf16.msra.mxu1 %v3070_v41  ;;  %v3157_v40 = vld [vmem:[%s4454_s1 + $0x4e0] ss:$16 sps:$4 sm:$0xff]   ;;  %v3160_v41 = vld [vmem:[%s4454_s1 + $0x4e8] ss:$16 sps:$4 sm:$0xff]  }
  0x64   :  { %1660 = vmatprep.subr.bf16.mxu0 %v3075_v42  ;;  %1824 = vmatprep.subr.bf16.mxu1 %v3078_v43  ;;  %v3165_v42 = vld [vmem:[%s4454_s1 + $0x504] ss:$16 sps:$4 sm:$0xff]   ;;  %v3168_v43 = vld [vmem:[%s4454_s1 + $0x50c] ss:$16 sps:$4 sm:$0xff]  }
  0x67   :  { %1661 = vmatpush1.bf16.msra.mxu0 %v3073_v44  ;;  %1825 = vmatpush1.bf16.msra.mxu1 %v3076_v45  ;;  %v3163_v44 = vld [vmem:[%s4454_s1 + $0x500] ss:$16 sps:$4 sm:$0xff]   ;;  %v3166_v45 = vld [vmem:[%s4454_s1 + $0x508] ss:$16 sps:$4 sm:$0xff]  }
  0x68   :  { %1662 = vmatprep.subr.bf16.mxu0 %v3081_v46  ;;  %1826 = vmatprep.subr.bf16.mxu1 %v3084_v47  ;;  %v3171_v46 = vld [vmem:[%s4454_s1 + $0x524] ss:$16 sps:$4 sm:$0xff]   ;;  %v3174_v47 = vld [vmem:[%s4454_s1 + $0x52c] ss:$16 sps:$4 sm:$0xff]  }
  0x6b   :  { %1663 = vmatpush1.bf16.msra.mxu0 %v3079_v48  ;;  %1827 = vmatpush1.bf16.msra.mxu1 %v3082_v49  ;;  %v3169_v48 = vld [vmem:[%s4454_s1 + $0x520] ss:$16 sps:$4 sm:$0xff]   ;;  %v3172_v49 = vld [vmem:[%s4454_s1 + $0x528] ss:$16 sps:$4 sm:$0xff]  }
  0x6c   :  { %1664 = vmatprep.subr.bf16.mxu0 %v3087_v50  ;;  %1828 = vmatprep.subr.bf16.mxu1 %v3090_v51  ;;  %v3177_v50 = vld [vmem:[%s4454_s1 + $0x544] ss:$16 sps:$4 sm:$0xff]   ;;  %v3180_v51 = vld [vmem:[%s4454_s1 + $0x54c] ss:$16 sps:$4 sm:$0xff]  }
  0x6f   :  { %1665 = vmatpush1.bf16.msra.mxu0 %v3085_v52  ;;  %1829 = vmatpush1.bf16.msra.mxu1 %v3088_v53  ;;  %v3175_v52 = vld [vmem:[%s4454_s1 + $0x540] ss:$16 sps:$4 sm:$0xff]   ;;  %v3178_v53 = vld [vmem:[%s4454_s1 + $0x548] ss:$16 sps:$4 sm:$0xff]  }
  0x70   :  { %1666 = vmatprep.subr.bf16.mxu0 %v3093_v54  ;;  %1830 = vmatprep.subr.bf16.mxu1 %v3096_v55  ;;  %v3183_v54 = vld [vmem:[%s4454_s1 + $0x564] ss:$16 sps:$4 sm:$0xff]   ;;  %v3186_v55 = vld [vmem:[%s4454_s1 + $0x56c] ss:$16 sps:$4 sm:$0xff]  }
  0x73   :  { %1667 = vmatpush1.bf16.msra.mxu0 %v3091_v56  ;;  %1831 = vmatpush1.bf16.msra.mxu1 %v3094_v57  ;;  %v3181_v56 = vld [vmem:[%s4454_s1 + $0x560] ss:$16 sps:$4 sm:$0xff]   ;;  %v3184_v57 = vld [vmem:[%s4454_s1 + $0x568] ss:$16 sps:$4 sm:$0xff]  }
  0x74   :  { %1668 = vmatprep.subr.bf16.mxu0 %v3099_v58  ;;  %1832 = vmatprep.subr.bf16.mxu1 %v3102_v59  ;;  %v3189_v58 = vld [vmem:[%s4454_s1 + $0x584] ss:$16 sps:$4 sm:$0xff]   ;;  %v3192_v59 = vld [vmem:[%s4454_s1 + $0x58c] ss:$16 sps:$4 sm:$0xff]  }
  0x77   :  { %1669 = vmatpush1.bf16.msra.mxu0 %v3097_v60  ;;  %1833 = vmatpush1.bf16.msra.mxu1 %v3100_v61  ;;  %v3187_v60 = vld [vmem:[%s4454_s1 + $0x580] ss:$16 sps:$4 sm:$0xff]   ;;  %v3190_v61 = vld [vmem:[%s4454_s1 + $0x588] ss:$16 sps:$4 sm:$0xff]  }
  0x78   :  { %1670 = vmatprep.subr.bf16.mxu0 %v3105_v62  ;;  %1834 = vmatprep.subr.bf16.mxu1 %v3108_v63  ;;  %v3195_v62 = vld [vmem:[%s4454_s1 + $0x5a4] ss:$16 sps:$4 sm:$0xff]   ;;  %v3198_v63 = vld [vmem:[%s4454_s1 + $0x5ac] ss:$16 sps:$4 sm:$0xff]  }
  0x7b   :  { %1671 = vmatpush1.bf16.msra.mxu0 %v3103_v0  ;;  %1835 = vmatpush1.bf16.msra.mxu1 %v3106_v1  ;;  %v3193_v0 = vld [vmem:[%s4454_s1 + $0x5a0] ss:$16 sps:$4 sm:$0xff]   ;;  %v3196_v1 = vld [vmem:[%s4454_s1 + $0x5a8] ss:$16 sps:$4 sm:$0xff]  }
  0x7c   :  { %1672 = vmatprep.subr.bf16.mxu0 %v3111_v2  ;;  %1836 = vmatprep.subr.bf16.mxu1 %v3114_v3  ;;  %v3201_v2 = vld [vmem:[%s4454_s1 + $0x5c4] ss:$16 sps:$4 sm:$0xff]   ;;  %v3204_v3 = vld [vmem:[%s4454_s1 + $0x5cc] ss:$16 sps:$4 sm:$0xff]  }
  0x7f   :  { %1673 = vmatpush1.bf16.msra.mxu0 %v3109_v4  ;;  %1837 = vmatpush1.bf16.msra.mxu1 %v3112_v5  ;;  %v3199_v4 = vld [vmem:[%s4454_s1 + $0x5c0] ss:$16 sps:$4 sm:$0xff]   ;;  %v3202_v5 = vld [vmem:[%s4454_s1 + $0x5c8] ss:$16 sps:$4 sm:$0xff]  }
  0x80   :  { %1683 = vmatprep.subr.bf16.mxu0 %v3117_v6  ;;  %1847 = vmatprep.subr.bf16.mxu1 %v3120_v8  ;;  %v3207_v6 = vld [vmem:[%s4454_s1 + $0x5e4] ss:$16 sps:$4 sm:$0xff]   ;;  %v3205_v8 = vld [vmem:[%s4454_s1 + $0x5e0] ss:$16 sps:$4 sm:$0xff]  }
  0x82   :  { %1675 = vmatmul.mubr.bf16.vlgmr.msra.gmra.mrb[0].mxu0 %v37_v11  ;;  %1839 = vmatmul.mubr.bf16.vlgmr.msra.gmra.mrb[0].mxu1 %v37_v11  ;;  %v31_v11 = vld [vmem:[%s4455_s0 + $0x20] sm:$0xff] }
  0x83   :  { %1684 = vmatpush1.bf16.msra.mxu0 %v3115_v9  ;;  %1848 = vmatpush1.bf16.msra.mxu1 %v3118_v10  ;;  %v3208_v9 = vld [vmem:[%s4454_s1 + $0x5e8] ss:$16 sps:$4 sm:$0xff]   ;;  %v3213_v10 = vld [vmem:[%s4454_s1 + $0x604] ss:$16 sps:$4 sm:$0xff]  }
  0x84   :  { %1685 = vmatprep.subr.bf16.mxu0 %v3123_v12  ;;  %1849 = vmatprep.subr.bf16.mxu1 %v3126_v13  ;;  %v3216_v12 = vld [vmem:[%s4454_s1 + $0x60c] ss:$16 sps:$4 sm:$0xff]   ;;  %v3211_v13 = vld [vmem:[%s4454_s1 + $0x600] ss:$16 sps:$4 sm:$0xff]  }
  0x85   :  { %1715 = vmatprep.mubr.bf16.mxu0 %v40_v15  ;;  %1879 = vmatprep.mubr.bf16.mxu1 %v40_v15  ;;  %v39_v15 = vpack.c.bf16 %v31_v11, %v31_v11  ;;  %v3306_v11 = vld [vmem:[%s4454_s1 + $0x7ec] ss:$16 sps:$4 sm:$0xff]  }
  0x87   :  { %1686 = vmatpush1.bf16.msra.mxu0 %v3121_v16  ;;  %1850 = vmatpush1.bf16.msra.mxu1 %v3124_v17  ;;  %v34_v16 = vld [vmem:[%s4455_s0 + $0x38] sm:$0xff]  ;;  %v3219_v17 = vld [vmem:[%s4454_s1 + $0x624] ss:$16 sps:$4 sm:$0xff]  }
  0x88   :  { %1687 = vmatprep.subr.bf16.mxu0 %v3129_v18  ;;  %1851 = vmatprep.subr.bf16.mxu1 %v3132_v19  ;;  %v3222_v18 = vld [vmem:[%s4454_s1 + $0x62c] ss:$16 sps:$4 sm:$0xff]   ;;  %v42_v19 = vpack.c.bf16 %v34_v16, %v34_v16 }
  0x89   :  { %v3333_v16 = vld [vmem:[%s4456_s3 + $0x104] ss:$8 sps:$4 sm:$0xff]  }
  0x8b   :  { %1688 = vmatpush1.bf16.msra.mxu0 %v3127_v20  ;;  %1852 = vmatpush1.bf16.msra.mxu1 %v3130_v21  ;;  %v3217_v20 = vld [vmem:[%s4454_s1 + $0x620] ss:$16 sps:$4 sm:$0xff]   ;;  %v3220_v21 = vld [vmem:[%s4454_s1 + $0x628] ss:$16 sps:$4 sm:$0xff]  }
  0x8c   :  { %1689 = vmatprep.subr.bf16.mxu0 %v3135_v22  ;;  %1853 = vmatprep.subr.bf16.mxu1 %v3138_v23  ;;  %v3225_v22 = vld [vmem:[%s4454_s1 + $0x644] ss:$16 sps:$4 sm:$0xff]   ;;  %v3228_v23 = vld [vmem:[%s4454_s1 + $0x64c] ss:$16 sps:$4 sm:$0xff]  }
  0x8f   :  { %1690 = vmatpush1.bf16.msra.mxu0 %v3133_v24  ;;  %1854 = vmatpush1.bf16.msra.mxu1 %v3136_v25  ;;  %v3223_v24 = vld [vmem:[%s4454_s1 + $0x640] ss:$16 sps:$4 sm:$0xff]   ;;  %v3226_v25 = vld [vmem:[%s4454_s1 + $0x648] ss:$16 sps:$4 sm:$0xff]  }
  0x90   :  { %1691 = vmatprep.subr.bf16.mxu0 %v3141_v26  ;;  %1855 = vmatprep.subr.bf16.mxu1 %v3144_v27  ;;  %v3231_v26 = vld [vmem:[%s4454_s1 + $0x664] ss:$16 sps:$4 sm:$0xff]   ;;  %v3234_v27 = vld [vmem:[%s4454_s1 + $0x66c] ss:$16 sps:$4 sm:$0xff]  }
  0x93   :  { %1692 = vmatpush1.bf16.msra.mxu0 %v3139_v28  ;;  %1856 = vmatpush1.bf16.msra.mxu1 %v3142_v29  ;;  %v3229_v28 = vld [vmem:[%s4454_s1 + $0x660] ss:$16 sps:$4 sm:$0xff]   ;;  %v3232_v29 = vld [vmem:[%s4454_s1 + $0x668] ss:$16 sps:$4 sm:$0xff]  }
  0x94   :  { %1693 = vmatprep.subr.bf16.mxu0 %v3147_v30  ;;  %1857 = vmatprep.subr.bf16.mxu1 %v3150_v31  ;;  %v3237_v30 = vld [vmem:[%s4454_s1 + $0x684] ss:$16 sps:$4 sm:$0xff]   ;;  %v3240_v31 = vld [vmem:[%s4454_s1 + $0x68c] ss:$16 sps:$4 sm:$0xff]  }
  0x97   :  { %1694 = vmatpush1.bf16.msra.mxu0 %v3145_v32  ;;  %1858 = vmatpush1.bf16.msra.mxu1 %v3148_v33  ;;  %v3235_v32 = vld [vmem:[%s4454_s1 + $0x680] ss:$16 sps:$4 sm:$0xff]   ;;  %v3238_v33 = vld [vmem:[%s4454_s1 + $0x688] ss:$16 sps:$4 sm:$0xff]  }
  0x98   :  { %1695 = vmatprep.subr.bf16.mxu0 %v3153_v34  ;;  %1859 = vmatprep.subr.bf16.mxu1 %v3156_v35  ;;  %v3243_v34 = vld [vmem:[%s4454_s1 + $0x6a4] ss:$16 sps:$4 sm:$0xff]   ;;  %v3246_v35 = vld [vmem:[%s4454_s1 + $0x6ac] ss:$16 sps:$4 sm:$0xff]  }
  0x9b   :  { %1696 = vmatpush1.bf16.msra.mxu0 %v3151_v36  ;;  %1860 = vmatpush1.bf16.msra.mxu1 %v3154_v37  ;;  %v3241_v36 = vld [vmem:[%s4454_s1 + $0x6a0] ss:$16 sps:$4 sm:$0xff]   ;;  %v3244_v37 = vld [vmem:[%s4454_s1 + $0x6a8] ss:$16 sps:$4 sm:$0xff]  }
  0x9c   :  { %1697 = vmatprep.subr.bf16.mxu0 %v3159_v38  ;;  %1861 = vmatprep.subr.bf16.mxu1 %v3162_v39  ;;  %v3249_v38 = vld [vmem:[%s4454_s1 + $0x6c4] ss:$16 sps:$4 sm:$0xff]   ;;  %v3252_v39 = vld [vmem:[%s4454_s1 + $0x6cc] ss:$16 sps:$4 sm:$0xff]  }
  0x9f   :  { %1698 = vmatpush1.bf16.msra.mxu0 %v3157_v40  ;;  %1862 = vmatpush1.bf16.msra.mxu1 %v3160_v41  ;;  %v3247_v40 = vld [vmem:[%s4454_s1 + $0x6c0] ss:$16 sps:$4 sm:$0xff]   ;;  %v3250_v41 = vld [vmem:[%s4454_s1 + $0x6c8] ss:$16 sps:$4 sm:$0xff]  }
  0xa0   :  { %1699 = vmatprep.subr.bf16.mxu0 %v3165_v42  ;;  %1863 = vmatprep.subr.bf16.mxu1 %v3168_v43  ;;  %v3255_v42 = vld [vmem:[%s4454_s1 + $0x6e4] ss:$16 sps:$4 sm:$0xff]   ;;  %v3258_v43 = vld [vmem:[%s4454_s1 + $0x6ec] ss:$16 sps:$4 sm:$0xff]  }
  0xa3   :  { %1700 = vmatpush1.bf16.msra.mxu0 %v3163_v44  ;;  %1864 = vmatpush1.bf16.msra.mxu1 %v3166_v45  ;;  %v3253_v44 = vld [vmem:[%s4454_s1 + $0x6e0] ss:$16 sps:$4 sm:$0xff]   ;;  %v3256_v45 = vld [vmem:[%s4454_s1 + $0x6e8] ss:$16 sps:$4 sm:$0xff]  }
  0xa4   :  { %1701 = vmatprep.subr.bf16.mxu0 %v3171_v46  ;;  %1865 = vmatprep.subr.bf16.mxu1 %v3174_v47  ;;  %v3261_v46 = vld [vmem:[%s4454_s1 + $0x704] ss:$16 sps:$4 sm:$0xff]   ;;  %v3264_v47 = vld [vmem:[%s4454_s1 + $0x70c] ss:$16 sps:$4 sm:$0xff]  }
  0xa7   :  { %1702 = vmatpush1.bf16.msra.mxu0 %v3169_v48  ;;  %1866 = vmatpush1.bf16.msra.mxu1 %v3172_v49  ;;  %v3259_v48 = vld [vmem:[%s4454_s1 + $0x700] ss:$16 sps:$4 sm:$0xff]   ;;  %v3262_v49 = vld [vmem:[%s4454_s1 + $0x708] ss:$16 sps:$4 sm:$0xff]  }
  0xa8   :  { %1703 = vmatprep.subr.bf16.mxu0 %v3177_v50  ;;  %1867 = vmatprep.subr.bf16.mxu1 %v3180_v51  ;;  %v3267_v50 = vld [vmem:[%s4454_s1 + $0x724] ss:$16 sps:$4 sm:$0xff]   ;;  %v3270_v51 = vld [vmem:[%s4454_s1 + $0x72c] ss:$16 sps:$4 sm:$0xff]  }
  0xab   :  { %1704 = vmatpush1.bf16.msra.mxu0 %v3175_v52  ;;  %1868 = vmatpush1.bf16.msra.mxu1 %v3178_v53  ;;  %v3265_v52 = vld [vmem:[%s4454_s1 + $0x720] ss:$16 sps:$4 sm:$0xff]   ;;  %v3268_v53 = vld [vmem:[%s4454_s1 + $0x728] ss:$16 sps:$4 sm:$0xff]  }
  0xac   :  { %1705 = vmatprep.subr.bf16.mxu0 %v3183_v54  ;;  %1869 = vmatprep.subr.bf16.mxu1 %v3186_v55  ;;  %v3273_v54 = vld [vmem:[%s4454_s1 + $0x744] ss:$16 sps:$4 sm:$0xff]   ;;  %v3276_v55 = vld [vmem:[%s4454_s1 + $0x74c] ss:$16 sps:$4 sm:$0xff]  }
  0xaf   :  { %1706 = vmatpush1.bf16.msra.mxu0 %v3181_v56  ;;  %1870 = vmatpush1.bf16.msra.mxu1 %v3184_v57  ;;  %v3271_v56 = vld [vmem:[%s4454_s1 + $0x740] ss:$16 sps:$4 sm:$0xff]   ;;  %v3274_v57 = vld [vmem:[%s4454_s1 + $0x748] ss:$16 sps:$4 sm:$0xff]  }
  0xb0   :  { %1707 = vmatprep.subr.bf16.mxu0 %v3189_v58  ;;  %1871 = vmatprep.subr.bf16.mxu1 %v3192_v59  ;;  %v3279_v58 = vld [vmem:[%s4454_s1 + $0x764] ss:$16 sps:$4 sm:$0xff]   ;;  %v3282_v59 = vld [vmem:[%s4454_s1 + $0x76c] ss:$16 sps:$4 sm:$0xff]  }
  0xb3   :  { %1708 = vmatpush1.bf16.msra.mxu0 %v3187_v60  ;;  %1872 = vmatpush1.bf16.msra.mxu1 %v3190_v61  ;;  %v3277_v60 = vld [vmem:[%s4454_s1 + $0x760] ss:$16 sps:$4 sm:$0xff]   ;;  %v3280_v61 = vld [vmem:[%s4454_s1 + $0x768] ss:$16 sps:$4 sm:$0xff]  }
  0xb4   :  { %1709 = vmatprep.subr.bf16.mxu0 %v3195_v62  ;;  %1873 = vmatprep.subr.bf16.mxu1 %v3198_v63  ;;  %v3285_v62 = vld [vmem:[%s4454_s1 + $0x784] ss:$16 sps:$4 sm:$0xff]   ;;  %v3288_v63 = vld [vmem:[%s4454_s1 + $0x78c] ss:$16 sps:$4 sm:$0xff]  }
  0xb7   :  { %1710 = vmatpush1.bf16.msra.mxu0 %v3193_v0  ;;  %1874 = vmatpush1.bf16.msra.mxu1 %v3196_v1  ;;  %v3283_v0 = vld [vmem:[%s4454_s1 + $0x780] ss:$16 sps:$4 sm:$0xff]   ;;  %v3286_v1 = vld [vmem:[%s4454_s1 + $0x788] ss:$16 sps:$4 sm:$0xff]  }
  0xb8   :  { %1711 = vmatprep.subr.bf16.mxu0 %v3201_v2  ;;  %1875 = vmatprep.subr.bf16.mxu1 %v3204_v3  ;;  %v3291_v2 = vld [vmem:[%s4454_s1 + $0x7a4] ss:$16 sps:$4 sm:$0xff]   ;;  %v3294_v3 = vld [vmem:[%s4454_s1 + $0x7ac] ss:$16 sps:$4 sm:$0xff]  }
  0xbb   :  { %1712 = vmatpush1.bf16.msra.mxu0 %v3199_v4  ;;  %1876 = vmatpush1.bf16.msra.mxu1 %v3202_v5  ;;  %v3289_v4 = vld [vmem:[%s4454_s1 + $0x7a0] ss:$16 sps:$4 sm:$0xff]   ;;  %v3292_v5 = vld [vmem:[%s4454_s1 + $0x7a8] ss:$16 sps:$4 sm:$0xff]  }
  0xbc   :  { %1713 = vmatprep.subr.bf16.mxu0 %v3207_v6  ;;  %1877 = vmatprep.subr.bf16.mxu1 %v3210_v7  ;;  %v3297_v6 = vld [vmem:[%s4454_s1 + $0x7c4] ss:$16 sps:$4 sm:$0xff]   ;;  %v3300_v7 = vld [vmem:[%s4454_s1 + $0x7cc] ss:$16 sps:$4 sm:$0xff]  }
  0xbf   :  { %1714 = vmatpush1.bf16.msra.mxu0 %v3205_v8  ;;  %1878 = vmatpush1.bf16.msra.mxu1 %v3208_v9  ;;  %v3295_v8 = vld [vmem:[%s4454_s1 + $0x7c0] ss:$16 sps:$4 sm:$0xff]   ;;  %v3298_v9 = vld [vmem:[%s4454_s1 + $0x7c8] ss:$16 sps:$4 sm:$0xff]  }
  0xc0   :  { %1724 = vmatprep.subr.bf16.mxu0 %v3213_v10  ;;  %1888 = vmatprep.subr.bf16.mxu1 %v3216_v12  ;;  %v3303_v10 = vld [vmem:[%s4454_s1 + $0x7e4] ss:$16 sps:$4 sm:$0xff]   ;;  %v3301_v12 = vld [vmem:[%s4454_s1 + $0x7e0] ss:$16 sps:$4 sm:$0xff]  }
  0xc2   :  { %1716 = vmatmul.mubr.bf16.vlgmr.msra.gmra.mrb[0].mxu0 %v39_v15  ;;  %1880 = vmatmul.mubr.bf16.vlgmr.msra.gmra.mrb[0].mxu1 %v39_v15  ;;  %v3309_v15 = vld [vmem:[%s4456_s3 + $0x4] ss:$8 sps:$4 sm:$0xff]  }
  0xc3   :  { %1725 = vmatpush1.bf16.msra.mxu0 %v3211_v13  ;;  %1889 = vmatpush1.bf16.msra.mxu1 %v3214_v14  ;;  %v3304_v13 = vld [vmem:[%s4454_s1 + $0x7e8] ss:$16 sps:$4 sm:$0xff]   ;;  %v33_v14 = vld [vmem:[%s4455_s0 + $0x30] sm:$0xff] }
  0xc4   :  { %1726 = vmatprep.subr.bf16.mxu0 %v3219_v17  ;;  %1890 = vmatprep.subr.bf16.mxu1 %v3222_v18  ;;  %v41_v17 = vpack.c.bf16 %v33_v14, %v33_v14  ;;  %v3307_v18 = vld [vmem:[%s4456_s3] ss:$8 sps:$4 sm:$0xff]  }
  0xc5   :  { %1756 = vmatprep.mubr.bf16.mxu0 %v42_v19  ;;  %1920 = vmatprep.mubr.bf16.mxu1 %v42_v19  ;;  %v3331_v19 = vld [vmem:[%s4456_s3 + $0x100] ss:$8 sps:$4 sm:$0xff]  }
  0xc7   :  { %1727 = vmatpush1.bf16.msra.mxu0 %v3217_v20  ;;  %1891 = vmatpush1.bf16.msra.mxu1 %v3220_v21  ;;  %v3312_v20 = vld [vmem:[%s4456_s3 + $0x14] ss:$8 sps:$4 sm:$0xff]  }
  0xc8   :  { %1728 = vmatprep.subr.bf16.mxu0 %v3225_v22  ;;  %1892 = vmatprep.subr.bf16.mxu1 %v3228_v23  ;;  %v3339_v21 = vld [vmem:[%s4456_s3 + $0x114] ss:$8 sps:$4 sm:$0xff]   ;;  %v3310_v22 = vld [vmem:[%s4456_s3 + $0x10] ss:$8 sps:$4 sm:$0xff]  }
  0xc9   :  { %v3337_v23 = vld [vmem:[%s4456_s3 + $0x110] ss:$8 sps:$4 sm:$0xff]  }
  0xcb   :  { %1729 = vmatpush1.bf16.msra.mxu0 %v3223_v24  ;;  %1893 = vmatpush1.bf16.msra.mxu1 %v3226_v25  ;;  %v3315_v24 = vld [vmem:[%s4456_s3 + $0x24] ss:$8 sps:$4 sm:$0xff]  }
  0xcc   :  { %1730 = vmatprep.subr.bf16.mxu0 %v3231_v26  ;;  %1894 = vmatprep.subr.bf16.mxu1 %v3234_v27  ;;  %v3345_v25 = vld [vmem:[%s4456_s3 + $0x124] ss:$8 sps:$4 sm:$0xff]   ;;  %v3313_v26 = vld [vmem:[%s4456_s3 + $0x20] ss:$8 sps:$4 sm:$0xff]  }
  0xcd   :  { %v3343_v27 = vld [vmem:[%s4456_s3 + $0x120] ss:$8 sps:$4 sm:$0xff]  }
  0xcf   :  { %1731 = vmatpush1.bf16.msra.mxu0 %v3229_v28  ;;  %1895 = vmatpush1.bf16.msra.mxu1 %v3232_v29  ;;  %v3318_v28 = vld [vmem:[%s4456_s3 + $0x34] ss:$8 sps:$4 sm:$0xff]  }
  0xd0   :  { %1732 = vmatprep.subr.bf16.mxu0 %v3237_v30  ;;  %1896 = vmatprep.subr.bf16.mxu1 %v3240_v31  ;;  %v3351_v29 = vld [vmem:[%s4456_s3 + $0x134] ss:$8 sps:$4 sm:$0xff]   ;;  %v3316_v30 = vld [vmem:[%s4456_s3 + $0x30] ss:$8 sps:$4 sm:$0xff]  }
  0xd1   :  { %v3349_v31 = vld [vmem:[%s4456_s3 + $0x130] ss:$8 sps:$4 sm:$0xff]  }
  0xd3   :  { %1733 = vmatpush1.bf16.msra.mxu0 %v3235_v32  ;;  %1897 = vmatpush1.bf16.msra.mxu1 %v3238_v33  ;;  %v3321_v32 = vld [vmem:[%s4456_s3 + $0x44] ss:$8 sps:$4 sm:$0xff]  }
  0xd4   :  { %1734 = vmatprep.subr.bf16.mxu0 %v3243_v34  ;;  %1898 = vmatprep.subr.bf16.mxu1 %v3246_v35  ;;  %v3357_v33 = vld [vmem:[%s4456_s3 + $0x144] ss:$8 sps:$4 sm:$0xff]   ;;  %v3319_v34 = vld [vmem:[%s4456_s3 + $0x40] ss:$8 sps:$4 sm:$0xff]  }
  0xd5   :  { %v3355_v35 = vld [vmem:[%s4456_s3 + $0x140] ss:$8 sps:$4 sm:$0xff]  }
  0xd7   :  { %1735 = vmatpush1.bf16.msra.mxu0 %v3241_v36  ;;  %1899 = vmatpush1.bf16.msra.mxu1 %v3244_v37  ;;  %v3324_v36 = vld [vmem:[%s4456_s3 + $0x54] ss:$8 sps:$4 sm:$0xff]  }
  0xd8   :  { %1736 = vmatprep.subr.bf16.mxu0 %v3249_v38  ;;  %1900 = vmatprep.subr.bf16.mxu1 %v3252_v39  ;;  %v3363_v37 = vld [vmem:[%s4456_s3 + $0x154] ss:$8 sps:$4 sm:$0xff]   ;;  %v3322_v38 = vld [vmem:[%s4456_s3 + $0x50] ss:$8 sps:$4 sm:$0xff]  }
  0xd9   :  { %v3361_v39 = vld [vmem:[%s4456_s3 + $0x150] ss:$8 sps:$4 sm:$0xff]  }
  0xdb   :  { %1737 = vmatpush1.bf16.msra.mxu0 %v3247_v40  ;;  %1901 = vmatpush1.bf16.msra.mxu1 %v3250_v41  ;;  %v3327_v40 = vld [vmem:[%s4456_s3 + $0x64] ss:$8 sps:$4 sm:$0xff]  }
  0xdc   :  { %1738 = vmatprep.subr.bf16.mxu0 %v3255_v42  ;;  %1902 = vmatprep.subr.bf16.mxu1 %v3258_v43  ;;  %v3369_v41 = vld [vmem:[%s4456_s3 + $0x164] ss:$8 sps:$4 sm:$0xff]   ;;  %v3325_v42 = vld [vmem:[%s4456_s3 + $0x60] ss:$8 sps:$4 sm:$0xff]  }
  0xdd   :  { %v3367_v43 = vld [vmem:[%s4456_s3 + $0x160] ss:$8 sps:$4 sm:$0xff]  }
  0xdf   :  { %1739 = vmatpush1.bf16.msra.mxu0 %v3253_v44  ;;  %1903 = vmatpush1.bf16.msra.mxu1 %v3256_v45  ;;  %v3330_v44 = vld [vmem:[%s4456_s3 + $0x74] ss:$8 sps:$4 sm:$0xff]   ;;  %v3328_v45 = vld [vmem:[%s4456_s3 + $0x70] ss:$8 sps:$4 sm:$0xff]  }
  0xe0   :  { %1740 = vmatprep.subr.bf16.mxu0 %v3261_v46  ;;  %1904 = vmatprep.subr.bf16.mxu1 %v3264_v47  ;;  %v3336_v46 = vld [vmem:[%s4456_s3 + $0x84] ss:$8 sps:$4 sm:$0xff]   ;;  %v3334_v47 = vld [vmem:[%s4456_s3 + $0x80] ss:$8 sps:$4 sm:$0xff]  }
  0xe3   :  { %1741 = vmatpush1.bf16.msra.mxu0 %v3259_v48  ;;  %1905 = vmatpush1.bf16.msra.mxu1 %v3262_v49  ;;  %v3342_v48 = vld [vmem:[%s4456_s3 + $0x94] ss:$8 sps:$4 sm:$0xff]   ;;  %v3340_v49 = vld [vmem:[%s4456_s3 + $0x90] ss:$8 sps:$4 sm:$0xff]  }
  0xe4   :  { %1742 = vmatprep.subr.bf16.mxu0 %v3267_v50  ;;  %1906 = vmatprep.subr.bf16.mxu1 %v3270_v51  ;;  %v3348_v50 = vld [vmem:[%s4456_s3 + $0xa4] ss:$8 sps:$4 sm:$0xff]   ;;  %v3346_v51 = vld [vmem:[%s4456_s3 + $0xa0] ss:$8 sps:$4 sm:$0xff]  }
  0xe7   :  { %1743 = vmatpush1.bf16.msra.mxu0 %v3265_v52  ;;  %1907 = vmatpush1.bf16.msra.mxu1 %v3268_v53  ;;  %v3354_v52 = vld [vmem:[%s4456_s3 + $0xb4] ss:$8 sps:$4 sm:$0xff]   ;;  %v3352_v53 = vld [vmem:[%s4456_s3 + $0xb0] ss:$8 sps:$4 sm:$0xff]  }
  0xe8   :  { %1744 = vmatprep.subr.bf16.mxu0 %v3273_v54  ;;  %1908 = vmatprep.subr.bf16.mxu1 %v3276_v55  ;;  %v3360_v54 = vld [vmem:[%s4456_s3 + $0xc4] ss:$8 sps:$4 sm:$0xff]   ;;  %v3358_v55 = vld [vmem:[%s4456_s3 + $0xc0] ss:$8 sps:$4 sm:$0xff]  }
  0xeb   :  { %1745 = vmatpush1.bf16.msra.mxu0 %v3271_v56  ;;  %1909 = vmatpush1.bf16.msra.mxu1 %v3274_v57  ;;  %v3366_v56 = vld [vmem:[%s4456_s3 + $0xd4] ss:$8 sps:$4 sm:$0xff]   ;;  %v3364_v57 = vld [vmem:[%s4456_s3 + $0xd0] ss:$8 sps:$4 sm:$0xff]  }
  0xec   :  { %1746 = vmatprep.subr.bf16.mxu0 %v3279_v58  ;;  %1910 = vmatprep.subr.bf16.mxu1 %v3282_v59  ;;  %v3372_v58 = vld [vmem:[%s4456_s3 + $0xe4] ss:$8 sps:$4 sm:$0xff]   ;;  %v3375_v59 = vld [vmem:[%s4456_s3 + $0x174] ss:$8 sps:$4 sm:$0xff]  }
  0xef   :  { %1747 = vmatpush1.bf16.msra.mxu0 %v3277_v60  ;;  %1911 = vmatpush1.bf16.msra.mxu1 %v3280_v61  ;;  %v3370_v60 = vld [vmem:[%s4456_s3 + $0xe0] ss:$8 sps:$4 sm:$0xff]   ;;  %v3373_v61 = vld [vmem:[%s4456_s3 + $0x170] ss:$8 sps:$4 sm:$0xff]  }
  0xf0   :  { %1748 = vmatprep.subr.bf16.mxu0 %v3285_v62  ;;  %1912 = vmatprep.subr.bf16.mxu1 %v3288_v63  ;;  %v1993_v62 = vld [vmem:[%s4456_s3 + $0x180] sm:$0xff]  ;;  %v3378_v63 = vld [vmem:[%s4456_s3 + $0xf4] ss:$8 sps:$4 sm:$0xff]  }
  0xf3   :  { %1749 = vmatpush1.bf16.msra.mxu0 %v3283_v0  ;;  %1913 = vmatpush1.bf16.msra.mxu1 %v3286_v1  ;;  %v2849_v0 = vcombine.high %v1993_v62, %v1993_v62  ;;  %v2848_v1 = vcombine.low %v1993_v62, %v1993_v62 }
  0xf4   :  { %1750 = vmatprep.subr.bf16.mxu0 %v3291_v2  ;;  %1914 = vmatprep.subr.bf16.mxu1 %v3294_v3  ;;  %v3376_v2 = vld [vmem:[%s4456_s3 + $0xf0] ss:$8 sps:$4 sm:$0xff]  }
  0xf5   :  { %v2257_v3 = vsel %vm2255_vm0, %v2848_v1, 0 }
  0xf7   :  { %1751 = vmatpush1.bf16.msra.mxu0 %v3289_v4  ;;  %1915 = vmatpush1.bf16.msra.mxu1 %v3292_v5  ;;  %v3381_v4 = vld [vmem:[%s4457_s5 + $0x40] sm:$0xff]   ;;  %v301_v5 = vlaneseq }
  0xf8   :  { %1752 = vmatprep.subr.bf16.mxu0 %v3297_v6  ;;  %1916 = vmatprep.subr.bf16.mxu1 %v3300_v7 }
  0xf9   :  { %v4383_v6 = vshrl.u32 %v301_v5, 7 }
  0xfb   :  { %1753 = vmatpush1.bf16.msra.mxu0 %v3295_v8  ;;  %1917 = vmatpush1.bf16.msra.mxu1 %v3298_v9  ;;  %v303_v7 = vsub.s32 0, %v4383_v6  ;;  %v311_v8 = vsub.s32 2, %v4383_v6  ;;  %v299_v9 = vld [vmem:[%s4458_s2] sm:$0xf] }
  0xfc   :  { %1754 = vmatprep.subr.bf16.mxu0 %v3303_v10  ;;  %1918 = vmatprep.subr.bf16.mxu1 %v3306_v11  ;;  %v307_v10 = vsub.s32 1, %v4383_v6  ;;  %v315_v11 = vsub.s32 3, %v4383_v6 }
  0xfe   :  { %v308_v14 = vrot.slane %v299_v9, %v307_v10 }
  0xff   :  { %1755 = vmatpush1.bf16.msra.mxu0 %v3301_v12  ;;  %1919 = vmatpush1.bf16.msra.mxu1 %v3304_v13  ;;  %v304_v12 = vrot.slane %v299_v9, %v303_v7  ;;  %v312_v13 = vrot.slane %v299_v9, %v311_v8 }
 0x100   :  { %2262 = vmatprep.subr.bf16.mxu0 %v3309_v15  ;;  %2303 = vmatprep.subr.bf16.mxu1 %v3333_v16  ;;  %v316_v15 = vrot.slane %v299_v9, %v315_v11 }
 0x102   :  { %1757 = vmatmul.mubr.bf16.vlgmr.msra.gmra.mrb[0].mxu0 %v41_v17  ;;  %1921 = vmatmul.mubr.bf16.vlgmr.msra.gmra.mrb[0].mxu1 %v41_v17 }
 0x103   :  { %2263 = vmatpush1.bf16.msra.mxu0 %v3307_v18  ;;  %2304 = vmatpush1.bf16.msra.mxu1 %v3331_v19 }
 0x104   :  { %2264 = vmatprep.subr.bf16.mxu0 %v3312_v20  ;;  %2305 = vmatprep.subr.bf16.mxu1 %v3339_v21 }
 0x107   :  { %2265 = vmatpush1.bf16.msra.mxu0 %v3310_v22  ;;  %2306 = vmatpush1.bf16.msra.mxu1 %v3337_v23 }
 0x108   :  { %2266 = vmatprep.subr.bf16.mxu0 %v3315_v24  ;;  %2307 = vmatprep.subr.bf16.mxu1 %v3345_v25 }
 0x10b   :  { %2267 = vmatpush1.bf16.msra.mxu0 %v3313_v26  ;;  %2308 = vmatpush1.bf16.msra.mxu1 %v3343_v27 }
 0x10c   :  { %2268 = vmatprep.subr.bf16.mxu0 %v3318_v28  ;;  %2309 = vmatprep.subr.bf16.mxu1 %v3351_v29 }
 0x10f   :  { %2269 = vmatpush1.bf16.msra.mxu0 %v3316_v30  ;;  %2310 = vmatpush1.bf16.msra.mxu1 %v3349_v31 }
 0x110   :  { %2270 = vmatprep.subr.bf16.mxu0 %v3321_v32  ;;  %2311 = vmatprep.subr.bf16.mxu1 %v3357_v33 }
 0x113   :  { %2271 = vmatpush1.bf16.msra.mxu0 %v3319_v34  ;;  %2312 = vmatpush1.bf16.msra.mxu1 %v3355_v35 }
 0x114   :  { %2272 = vmatprep.subr.bf16.mxu0 %v3324_v36  ;;  %2313 = vmatprep.subr.bf16.mxu1 %v3363_v37 }
 0x117   :  { %2273 = vmatpush1.bf16.msra.mxu0 %v3322_v38  ;;  %2314 = vmatpush1.bf16.msra.mxu1 %v3361_v39  ;;  %v3382_v38 = vld [vmem:[%s4457_s5] sm:$0xff]  }
 0x118   :  { %2274 = vmatprep.subr.bf16.mxu0 %v3327_v40  ;;  %2315 = vmatprep.subr.bf16.mxu1 %v3369_v41  ;;  %v3383_v41 = vld [vmem:[%s4457_s5 + $0x48] sm:$0xff]  }
 0x11b   :  { %2275 = vmatpush1.bf16.msra.mxu0 %v3325_v42  ;;  %2316 = vmatpush1.bf16.msra.mxu1 %v3367_v43  ;;  %v3384_v42 = vld [vmem:[%s4457_s5 + $0x8] sm:$0xff]   ;;  %v3385_v43 = vld [vmem:[%s4457_s5 + $0x50] sm:$0xff]  }
 0x11c   :  { %2276 = vmatprep.subr.bf16.mxu0 %v3330_v44  ;;  %2317 = vmatprep.subr.bf16.mxu1 %v3375_v59  ;;  %v3386_v44 = vld [vmem:[%s4457_s5 + $0x10] sm:$0xff]  }
 0x11f   :  { %2277 = vmatpush1.bf16.msra.mxu0 %v3328_v45  ;;  %2318 = vmatpush1.bf16.msra.mxu1 %v3373_v61  ;;  %v3387_v45 = vld [vmem:[%s4457_s5 + $0x58] sm:$0xff]  }
 0x120   :  { %2278 = vmatprep.subr.bf16.mxu0 %v3336_v46  ;;  %2850 = vmatprep.subr.msk.bf16.mxu1 %vm2255_vm0, %v2849_v0  ;;  %v3388_v46 = vld [vmem:[%s4457_s5 + $0x18] sm:$0xff]  }
 0x123   :  { %2279 = vmatpush1.bf16.msra.mxu0 %v3334_v47  ;;  %2320 = vmatpush1.bf16.msra.mxu1 %v2257_v3  ;;  %v3389_v47 = vld [vmem:[%s4457_s5 + $0x60] sm:$0xff]  }
 0x124   :  { %2280 = vmatprep.subr.bf16.mxu0 %v3342_v48  ;;  %2869 = vmatprep.subr.bf16.mxu1 %v3381_v4  ;;  %v3390_v48 = vld [vmem:[%s4457_s5 + $0x20] sm:$0xff]  }
 0x127   :  { %2281 = vmatpush1.bf16.msra.mxu0 %v3340_v49  ;;  %v3391_v49 = vld [vmem:[%s4457_s5 + $0x68] sm:$0xff]  }
 0x128   :  { %2282 = vmatprep.subr.bf16.mxu0 %v3348_v50  ;;  %v3392_v50 = vld [vmem:[%s4457_s5 + $0x28] sm:$0xff]  }
 0x12b   :  { %2283 = vmatpush1.bf16.msra.mxu0 %v3346_v51  ;;  %v3393_v51 = vld [vmem:[%s4457_s5 + $0x70] sm:$0xff]  }
 0x12c   :  { %2284 = vmatprep.subr.bf16.mxu0 %v3354_v52  ;;  %v3394_v52 = vld [vmem:[%s4457_s5 + $0x30] sm:$0xff]  }
 0x12f   :  { %2285 = vmatpush1.bf16.msra.mxu0 %v3352_v53  ;;  %v3395_v53 = vld [vmem:[%s4457_s5 + $0x78] sm:$0xff]  }
 0x130   :  { %2286 = vmatprep.subr.bf16.mxu0 %v3360_v54  ;;  %v3396_v54 = vld [vmem:[%s4457_s5 + $0x38] sm:$0xff]  }
 0x133   :  { %2287 = vmatpush1.bf16.msra.mxu0 %v3358_v55  ;;  %v1994_v55 = vld [vmem:[%s4459_s4] sm:$0x3] }
 0x134   :  { %2288 = vmatprep.subr.bf16.mxu0 %v3366_v56  ;;  %v1999_v56 = vrot.slane %v1994_v55, %v303_v7 }
 0x137   :  { %2289 = vmatpush1.bf16.msra.mxu0 %v3364_v57  ;;  %v2003_v57 = vrot.slane %v1994_v55, %v307_v10 }
 0x138   :  { %2290 = vmatprep.subr.bf16.mxu0 %v3372_v58 }
 0x13b   :  { %2291 = vmatpush1.bf16.msra.mxu0 %v3370_v60 }
 0x13c   :  { %2292 = vmatprep.subr.bf16.mxu0 %v3378_v63 }
 0x13f   :  { %2293 = vmatpush1.bf16.msra.mxu0 %v3376_v2 }
 0x1d5   :  { %v1758_v16 = vpop.f32.mrb[0].mxu0  ;;  %v1922_v17 = vpop.f32.mrb[0].mxu1 }
 0x1d6   :  { %v2891_v18 = vadd.f32 %v1758_v16, %v304_v12  ;;  %v2893_v19 = vadd.f32 %v1922_v17, %v312_v13  ;;  %v1760_v20 = vpop.f32.mrb[1].mxu0  ;;  %v1924_v21 = vpop.f32.mrb[1].mxu1 }
 0x1d7   :  { %v2892_v22 = vadd.f32 %v1760_v20, %v308_v14  ;;  %v2894_v23 = vadd.f32 %v1924_v21, %v316_v15  ;;  %v1762_v24 = vpop.f32.mrb[2].mxu0  ;;  %v1926_v25 = vpop.f32.mrb[2].mxu1  ;;  %v2852_v14 = vld [vmem:[%s4460_s6] ss:$0 sm:$0xff] }
 0x1d8   :  { %vm1929_vm1 = vcmp.ge.f32.partialorder %v2891_v18, 0.0  ;;  %v1933_v26 = vmul.f32 0.05, %v2891_v18  ;;  %vm1931_vm2 = vcmp.ge.f32.partialorder %v2893_v19, 0.0  ;;  %v1935_v27 = vmul.f32 0.05, %v2893_v19 }
 0x1d9   :  { %vm1930_vm3 = vcmp.ge.f32.partialorder %v2892_v22, 0.0  ;;  %v1934_v28 = vmul.f32 0.05, %v2892_v22  ;;  %vm1932_vm4 = vcmp.ge.f32.partialorder %v2894_v23, 0.0  ;;  %v1936_v29 = vmul.f32 0.05, %v2894_v23 }
 0x1da   :  { %v1937_v30 = vsel %vm1929_vm1, %v2891_v18, %v1933_v26  ;;  %v1939_v31 = vsel %vm1931_vm2, %v2893_v19, %v1935_v27  ;;  %v1763_v32 = vpop.f32.mrb[3].mxu0  ;;  %v1927_v33 = vpop.f32.mrb[3].mxu1 }
 0x1db   :  { %v1940_v34 = vsel %vm1932_vm4, %v2894_v23, %v1936_v29  ;;  %v1938_v35 = vsel %vm1930_vm3, %v2892_v22, %v1934_v28  ;;  %v1941_v39 = vpack.c.bf16 %v1937_v30, %v1937_v30  ;;  %v1943_v40 = vpack.c.bf16 %v1939_v31, %v1939_v31 }
 0x1dc   :  { %v1944_v36 = vpack.c.bf16 %v1940_v34, %v1940_v34  ;;  %v1942_v37 = vpack.c.bf16 %v1938_v35, %v1938_v35 }
 0x1de   :  { %2294 = vmatprep.mubr.bf16.mxu0 %v1942_v37  ;;  %2851 = vmatprep.mubr.msk.bf16.mxu1 %vm2251_vm5, %v1944_v36 }
 0x1df   :  { %2295 = vmatmul.mubr.bf16.vlgmr.msra.gmra.mrb[4].mxu0 %v1941_v39  ;;  %2336 = vmatmul.mubr.bf16.vlgmr.msra.gmra.mrb[4].mxu1 %v1943_v40 }
 0x1e0   :  { %2870 = vmatpush3.bf16.msra.mxu1 %v3382_v38 }
 0x1e1   :  { %2871 = vmatprep.subr.bf16.mxu1 %v3383_v41 }
 0x1e4   :  { %2872 = vmatpush3.bf16.msra.mxu1 %v3384_v42 }
 0x1e5   :  { %2873 = vmatprep.subr.bf16.mxu1 %v3385_v43 }
 0x1e8   :  { %2874 = vmatpush3.bf16.msra.mxu1 %v3386_v44 }
 0x1e9   :  { %2875 = vmatprep.subr.bf16.mxu1 %v3387_v45 }
 0x1ec   :  { %2876 = vmatpush3.bf16.msra.mxu1 %v3388_v46 }
 0x1ed   :  { %2877 = vmatprep.subr.bf16.mxu1 %v3389_v47 }
 0x1f0   :  { %2878 = vmatpush3.bf16.msra.mxu1 %v3390_v48 }
 0x1f1   :  { %2879 = vmatprep.subr.bf16.mxu1 %v3391_v49 }
 0x1f4   :  { %2880 = vmatpush3.bf16.msra.mxu1 %v3392_v50 }
 0x1f5   :  { %2881 = vmatprep.subr.bf16.mxu1 %v3393_v51 }
 0x1f8   :  { %2882 = vmatpush3.bf16.msra.mxu1 %v3394_v52 }
 0x1f9   :  { %2883 = vmatprep.subr.bf16.mxu1 %v3395_v53 }
 0x1fc   :  { %2884 = vmatpush3.bf16.msra.mxu1 %v3396_v54 }
 0x2b2   :  { %v2296_v58 = vpop.f32.mrb[4].mxu0  ;;  %v2337_v59 = vpop.f32.mrb[4].mxu1 }
 0x2b3   :  { %v2297_v60 = vadd.f32 %v2296_v58, %v1999_v56  ;;  %v2298_v61 = vpop.f32.mrb[5].mxu0  ;;  %v2339_v62 = vpop.f32.mrb[5].mxu1 }
 0x2b4   :  { %v2299_v63 = vadd.f32 %v2298_v61, %v2003_v57  ;;  %v2300_v0 = vpop.f32.mrb[6].mxu0  ;;  %v2341_v1 = vpop.f32.mrb[6].mxu1 }
 0x2b5   :  { %v2338_v2 = vadd.f32 %v2337_v59, %v2297_v60  ;;  %v2301_v3 = vpop.f32.mrb[7].mxu0  ;;  %v2342_v4 = vpop.f32.mrb[7].mxu1 }
 0x2b6   :  { %v2340_v5 = vadd.f32 %v2339_v62, %v2299_v63 }
 0x2b7   :  { %vm2344_vm6 = vcmp.ge.f32.partialorder %v2338_v2, 0.0  ;;  %v2346_v8 = vmul.f32 0.05, %v2338_v2 }
 0x2b8   :  { %vm2345_vm7 = vcmp.ge.f32.partialorder %v2340_v5, 0.0  ;;  %v2347_v9 = vmul.f32 0.05, %v2340_v5 }
 0x2b9   :  { %v2348_v7 = vsel %vm2344_vm6, %v2338_v2, %v2346_v8 }
 0x2ba   :  { %v2349_v11 = vsel %vm2345_vm7, %v2340_v5, %v2347_v9  ;;  %v2350_v10 = vpack.c.bf16 %v2348_v7, %v2348_v7 }
 0x2bb   :  { %v2351_v6 = vpack.c.bf16 %v2349_v11, %v2349_v11 }
 0x2bd   :  { %2519 = vmatprep.mubr.bf16.mxu1 %v2351_v6 }
 0x2be   :  { %2520 = vmatmul.mubr.bf16.vlgmr.msra.gmra.mrb[8].mxu1 %v2350_v10 }
 0x391   :  { %v2885_v12 = vpop.f32.mrb[8].mxu1 }
 0x392   :  { %v2886_v13 = vpop.f32.mrb[9].mxu1 }
 0x393   :  { %v2887_v15 = vadd.f32 %v2886_v13, %v2885_v12  ;;  %v2888_v16 = vpop.f32.mrb[10].mxu1 }
 0x394   :  { %v2889_v17 = vpop.f32.mrb[11].mxu1 }
 0x395   :  { %v2522_v18 = vadd.f32 %v2887_v15, %v2852_v14 }
 0x397   :  { %2527 = vmax.xlane.f32.xlu0 %v2522_v18 }
 0x424   :  { %v2528_v19 = vpop.xlane.xlu0 %2527 }
 0x425   :  { %v2529_v20 = vsub.f32 %v2522_v18, %v2528_v19 }
 0x427   :  { %v2530_v21 = vmul.f32 1.442695, %v2529_v20 }
 0x429   :  { %3397 = vpow2.f32 %v2530_v21 }
 0x433   :  { %v3398_v22 = vpop.eup %3397 }
 0x434   :  { %2532 = vadd.xlane.f32.xlu0 %v3398_v22 }
 0x4c1   :  { %v2533_v23 = vpop.xlane.xlu0 %2532 }
 0x4c2   :  { %3399 = vrcp.f32 %v2533_v23 }
 0x4cc   :  { %v3400_v24 = vpop.eup %3399 }
 0x4cd   :  { %v2535_v25 = vmul.f32 %v3400_v24, %v2533_v23 }
 0x4cf   :  { %v2536_v26 = vsub.f32 2.0, %v2535_v25 }
 0x4d1   :  { %v2537_v27 = vmul.f32 %v3400_v24, %v2536_v26 }
 0x4d3   :  { %v2538_v28 = vmul.f32 %v3398_v22, %v2537_v27 }
 0x4d5   :  { %2539 = vst [vmem:[%s4461_s7] sm:$0xff] %v2538_v28 }

</bundles_post_ra>
